<compile_context>
chip_gen: v6e
topology: v6e:2x2x1
jax: 0.10.0
libtpu: 0.0.40
codegen_flags: <defaults>
</compile_context>

<pallas_src>
import functools
import math

import jax
import jax.numpy as jnp
from jax.experimental import pallas as pl
from jax.experimental.pallas import tpu as pltpu


_VMEM_LIMIT_BYTES = 48 * 1024 * 1024  # > v5e 16 MiB default, < v7x 64 MiB physical


# ----------------------------------------------------------------------------
# small tiling helpers
# ----------------------------------------------------------------------------
def _round_up(x, m):
    return ((x + m - 1) // m) * m


def _embed_tile(tokens_per_batch, gg, target=512):
    """Row tile for the patch-embed kernel: a multiple of lcm(gg, 8) that
    divides tokens_per_batch (tiles never span a batch element)."""
    unit = gg * 8 // math.gcd(gg, 8)  # lcm(gg, 8)
    if tokens_per_batch % unit != 0:
        assert tokens_per_batch % 8 == 0, "tokens per batch must be a multiple of 8"
        return tokens_per_batch
    k = tokens_per_batch // unit
    best = 1
    for d in range(1, k + 1):
        if k % d == 0 and d * unit <= target:
            best = d
    return best * unit


def _pick_group_tile(n_groups, seq_len, target_rows=512):
    """Groups per grid step for the Dualist kernel (>=2 grid steps when possible
    so both v7x TensorCores get work; gpt*seq_len kept a multiple of 8)."""
    gpt = max(1, min(n_groups, target_rows // max(seq_len, 1)))
    if n_groups >= 2:
        gpt = min(gpt, pl.cdiv(n_groups, 2))
    while (gpt * seq_len) % 8 != 0 and gpt < n_groups:
        gpt += 1
    n_pad = _round_up(n_groups, gpt)
    return gpt, n_pad


# ----------------------------------------------------------------------------
# reorder helpers (exact port of the reference helpers)
# ----------------------------------------------------------------------------
def create_reorder_index(N):
    new_order = []
    for col in range(N):
        if col % 2 == 0:
            new_order.extend(range(col, N * N, N))
        else:
            new_order.extend(range(col + N * (N - 1), col - 1, -N))
    return jnp.asarray(new_order, dtype=jnp.int32)


def reorder_data(data, N):
    idx = create_reorder_index(N)
    return jnp.take(data, idx, axis=2)


def _dualist_perm(b, t, gg, fusing_ratios):
    """Flat row permutation reproducing the reference's
    view -> permute -> reorder_data -> permute -> view chain as ONE gather index."""
    f_h = int(math.sqrt(gg))
    s = f_h // fusing_ratios
    ids = jnp.arange(b * t * gg, dtype=jnp.int32).reshape(b, t, gg)
    so = ids.reshape(b, t, fusing_ratios, s, fusing_ratios, s)
    xs = so.transpose(0, 2, 4, 1, 3, 5).reshape(b * s * s, t, -1)
    xs = reorder_data(xs, fusing_ratios)          # gather along dim 2
    xs = xs.transpose(0, 2, 1).reshape(-1)
    return xs, s


# ----------------------------------------------------------------------------
# Pallas kernels
# ----------------------------------------------------------------------------
def _patch_embed_ln_kernel(x_ref, w_ref, b_ref, pos_ref, g_ref, beta_ref,
                           tok_ref, gsum_ref, *, reps):
    # Fused: patch-embed matmul + bias + positional embedding + pre-LayerNorm,
    # plus a per-batch running sum of the encoder output (for the global mean).
    acc = jnp.dot(x_ref[...], w_ref[...], preferred_element_type=jnp.float32)
    pos = jnp.tile(pos_ref[...], (reps, 1))               # (tm, C)
    h = acc + b_ref[...] + pos
    mu = jnp.mean(h, axis=-1, keepdims=True)
    var = jnp.mean((h - mu) ** 2, axis=-1, keepdims=True)
    y = (h - mu) * jax.lax.rsqrt(var + 1e-5) * g_ref[...] + beta_ref[...]
    tok_ref[...] = y.astype(tok_ref.dtype)

    @pl.when(pl.program_id(1) == 0)
    def _():
        gsum_ref[...] = jnp.zeros_like(gsum_ref)

    part = jnp.sum(y, axis=0)                              # (C,) f32
    gsum_ref[...] += part[None, None, :]


def patch_embed_ln(patches, w, bias, pos, ln_g, ln_b, *, batch, frames,
                   tokens_per_image):
    M, K = patches.shape
    C = w.shape[1]
    gg = tokens_per_image
    tpb = frames * gg
    assert M == batch * tpb

    tm = _embed_tile(tpb, gg, target=512)
    jt = tpb // tm
    reps = tm // gg

    xp = patches.astype(jnp.bfloat16)
    wp = w.astype(jnp.bfloat16)
    kern = functools.partial(_patch_embed_ln_kernel, reps=reps)

    tokens, gsum = pl.pallas_call(
        kern,
        out_shape=(jax.ShapeDtypeStruct((M, C), jnp.bfloat16),
                   jax.ShapeDtypeStruct((batch, 8, C), jnp.float32)),
        grid=(batch, jt),
        in_specs=[
            pl.BlockSpec((tm, K), lambda i, j: (i * jt + j, 0)),
            pl.BlockSpec((K, C), lambda i, j: (0, 0)),
            pl.BlockSpec((1, C), lambda i, j: (0, 0)),
            pl.BlockSpec((gg, C), lambda i, j: (0, 0)),
            pl.BlockSpec((1, C), lambda i, j: (0, 0)),
            pl.BlockSpec((1, C), lambda i, j: (0, 0)),
        ],
        out_specs=(pl.BlockSpec((tm, C), lambda i, j: (i * jt + j, 0)),
                   pl.BlockSpec((1, 8, C), lambda i, j: (i, 0, 0))),
        compiler_params=pltpu.CompilerParams(
            dimension_semantics=("parallel", "arbitrary"),
            vmem_limit_bytes=_VMEM_LIMIT_BYTES),
    )(xp, wp, bias.reshape(1, C), pos, ln_g.reshape(1, C), ln_b.reshape(1, C))
    return tokens, gsum


def _dualist_mean_kernel(x_ref, g_ref, bta_ref, w1_ref, b1_ref, w2_ref, b2_ref,
                         o_ref, *, seq_len):
    # Fused pre-LN residual MLP + per-group mean over the sequence length:
    #   y = x + gelu(LN(x) @ W1 + b1) @ W2 + b2 ;  out[g] = mean_L y[g, :]
    # Only the (groups, C) means are written back (broadcast to 8 sublanes so
    # the output block satisfies the (8, 128) tiling rule).
    x = x_ref[...].astype(jnp.float32)                     # (gpt*L, C)
    mu = jnp.mean(x, axis=-1, keepdims=True)
    var = jnp.mean((x - mu) ** 2, axis=-1, keepdims=True)
    xn = (x - mu) * jax.lax.rsqrt(var + 1e-5) * g_ref[...] + bta_ref[...]
    h = jnp.dot(xn.astype(jnp.bfloat16), w1_ref[...],
                preferred_element_type=jnp.float32) + b1_ref[...]
    # TODO(synk): tanh-approx GELU (torch default is exact erf); the reference
    # ResidualBlock(DualistConfig) is undefined upstream, this is a stand-in.
    h = jax.nn.gelu(h)
    y = x + jnp.dot(h.astype(jnp.bfloat16), w2_ref[...],
                    preferred_element_type=jnp.float32) + b2_ref[...]
    gpt = y.shape[0] // seq_len
    means = jnp.mean(y.reshape(gpt, seq_len, y.shape[1]), axis=1)  # (gpt, C)
    o_ref[...] = jnp.broadcast_to(means[:, None, :], o_ref.shape).astype(o_ref.dtype)


def dualist_group_mean(xs, ln_g, ln_b, w1, b1, w2, b2, *, n_groups, seq_len,
                       target_rows=512):
    # TODO(synk): ResidualBlock(DualistConfig) definition is not provided
    # upstream; this fused residual MLP (+ fused mean over L) is a stand-in.
    rows, C = xs.shape
    H = w1.shape[1]
    assert rows == n_groups * seq_len
    gpt, n_pad = _pick_group_tile(n_groups, seq_len, target_rows)
    rows_pad = n_pad * seq_len
    xp = xs if rows_pad == rows else jnp.pad(xs, ((0, rows_pad - rows), (0, 0)))

    kern = functools.partial(_dualist_mean_kernel, seq_len=seq_len)
    out = pl.pallas_call(
        kern,
        out_shape=jax.ShapeDtypeStruct((n_pad, 8, C), jnp.float32),
        grid=(n_pad // gpt,),
        in_specs=[
            pl.BlockSpec((gpt * seq_len, C), lambda i: (i, 0)),
            pl.BlockSpec((1, C), lambda i: (0, 0)),
            pl.BlockSpec((1, C), lambda i: (0, 0)),
            pl.BlockSpec((C, H), lambda i: (0, 0)),
            pl.BlockSpec((1, H), lambda i: (0, 0)),
            pl.BlockSpec((H, C), lambda i: (0, 0)),
            pl.BlockSpec((1, C), lambda i: (0, 0)),
        ],
        out_specs=pl.BlockSpec((gpt, 8, C), lambda i: (i, 0, 0)),
        compiler_params=pltpu.CompilerParams(
            dimension_semantics=("parallel",),
            vmem_limit_bytes=_VMEM_LIMIT_BYTES),
    )(xp, ln_g.reshape(1, C), ln_b.reshape(1, C),
      w1.astype(jnp.bfloat16), b1.reshape(1, H),
      w2.astype(jnp.bfloat16), b2.reshape(1, C))
    return out[:n_groups, 0, :]                            # (n_groups, C) f32


def _fc1_kernel(x_ref, w_ref, b_ref, o_ref):
    o_ref[...] = (jnp.dot(x_ref[...], w_ref[...],
                          preferred_element_type=jnp.float32)
                  + b_ref[...]).astype(o_ref.dtype)


def fc1_head(feats, w, bias, *, class_num):
    B, Kf = feats.shape
    N = w.shape[1]
    Mp = _round_up(max(B, 8), 8)
    Npad = max(128, _round_up(N, 128))
    xp = jnp.pad(feats, ((0, Mp - B), (0, 0))).astype(jnp.float32)
    wp = jnp.pad(w, ((0, 0), (0, Npad - N))).astype(jnp.float32)
    bp = jnp.pad(bias, (0, Npad - N)).reshape(1, Npad).astype(jnp.float32)

    out = pl.pallas_call(
        _fc1_kernel,
        out_shape=jax.ShapeDtypeStruct((Mp, Npad), jnp.float32),
        grid=(1,),
        in_specs=[pl.BlockSpec((Mp, Kf), lambda i: (0, 0)),
                  pl.BlockSpec((Kf, Npad), lambda i: (0, 0)),
                  pl.BlockSpec((1, Npad), lambda i: (0, 0))],
        out_specs=pl.BlockSpec((Mp, Npad), lambda i: (0, 0)),
        compiler_params=pltpu.CompilerParams(
            dimension_semantics=("arbitrary",),
            vmem_limit_bytes=_VMEM_LIMIT_BYTES),
    )(xp, wp, bp)
    return out[:B, :class_num]


# ----------------------------------------------------------------------------
# Parameter construction (deterministic, synthetic)
# ----------------------------------------------------------------------------
def make_params(key, *, channel, patch, in_ch, grid_side, fusing_ratios,
                class_num, hidden_mult=2):
    ks = jax.random.split(key, 5)
    pdim = in_ch * patch * patch
    gg = grid_side * grid_side
    s = grid_side // fusing_ratios
    patch_nums = s * s
    H = hidden_mult * channel
    fc1_in = (patch_nums + 1) * channel
    xav = math.sqrt(6.0 / (fc1_in + class_num))
    return {
        # TODO(synk): pretrained CLIP ViT (clip.load('ViT-B-14')) cannot be
        # reproduced in-script; patch-embed + pos-embed + LayerNorm stand-in.
        "patch_w": 0.02 * jax.random.normal(ks[0], (pdim, channel), jnp.float32),
        "patch_b": jnp.zeros((channel,), jnp.float32),
        "pos": 0.02 * jax.random.normal(ks[1], (gg, channel), jnp.float32),
        "pre_ln_g": jnp.ones((channel,), jnp.float32),
        "pre_ln_b": jnp.zeros((channel,), jnp.float32),
        # Dualist stand-in block.
        "d_ln_g": jnp.ones((channel,), jnp.float32),
        "d_ln_b": jnp.zeros((channel,), jnp.float32),
        "d_w1": 0.02 * jax.random.normal(ks[2], (channel, H), jnp.float32),
        "d_b1": jnp.zeros((H,), jnp.float32),
        "d_w2": 0.02 * jax.random.normal(ks[3], (H, channel), jnp.float32),
        "d_b2": jnp.zeros((channel,), jnp.float32),
        # fc1 (xavier-uniform, zero bias, as in initialize_weights).
        "fc1_w": jax.random.uniform(ks[4], (fc1_in, class_num), jnp.float32, -xav, xav),
        "fc1_b": jnp.zeros((class_num,), jnp.float32),
    }


# ----------------------------------------------------------------------------
# Forward pass (matches CLIP_Dualist.forward semantics)
# ----------------------------------------------------------------------------
def clip_dualist_forward(x, params, *, patch=8, fusing_ratios=2, class_num=1):
    b, t, in_ch, h, w = x.shape
    assert h == w and h % patch == 0
    g = h // patch
    gg = g * g
    c = params["patch_w"].shape[1]

    # ---- synthetic encoder (stand-in for clip_model.encode_image) ----
    # im2col (plain JAX glue), then fused patch-embed + pos + pre-LN + global
    # token-sum kernel; encoder tokens come back in bf16.
    images = x.reshape(b * t, in_ch, h, w)
    patches = images.reshape(b * t, in_ch, g, patch, g, patch)
    patches = patches.transpose(0, 2, 4, 1, 3, 5).reshape(
        b * t * gg, in_ch * patch * patch)
    tokens, gsum = patch_embed_ln(
        patches, params["patch_w"], params["patch_b"], params["pos"],
        params["pre_ln_g"], params["pre_ln_b"],
        batch=b, frames=t, tokens_per_image=gg)                 # (bt*gg, c) bf16

    # global_feat = sequence_output.reshape(b, -1, c).mean(1), fused into the
    # encoder kernel as a per-batch running sum (f32).
    global_feat = gsum[:, 0, :] / float(t * gg)                 # (b, c)

    # ---- forward() grouping glue as ONE gather (exact reference ordering) ----
    perm, s = _dualist_perm(b, t, gg, fusing_ratios)
    b_l = b * s * s
    L = perm.size // b_l
    xs = jnp.take(tokens, perm, axis=0)                         # (b_l*L, c) bf16

    # ---- Dualist block with fused mean over L (res is never materialized) ----
    vmeans = dualist_group_mean(
        xs, params["d_ln_g"], params["d_ln_b"],
        params["d_w1"], params["d_b1"], params["d_w2"], params["d_b2"],
        n_groups=b_l, seq_len=L)                                # (b_l, c) f32
    video_feat = vmeans.reshape(b, s * s * c)

    # ---- head: concat(global, video) -> fc1 (lane-dense, padded to 128) ----
    feats = jnp.concatenate([global_feat, video_feat], axis=1)  # (b, (ss+1)*c)
    return fc1_head(feats, params["fc1_w"], params["fc1_b"], class_num=class_num)


# ----------------------------------------------------------------------------
if __name__ == "__main__":
    # Small shapes consistent with the forward: b=2, t=4 frames of 3x32x32,
    # patch=8 -> 4x4=16 tokens/image, channel=128, fusing_ratios=2, class_num=1.
    b, t, in_ch, h, w = 2, 4, 3, 32, 32
    patch, channel, class_num, fusing_ratios = 8, 128, 1, 2
    grid_side = h // patch

    key = jax.random.PRNGKey(0)
    kx, kp = jax.random.split(key)
    x = jax.random.normal(kx, (b, t, in_ch, h, w), jnp.float32)
    params = make_params(kp, channel=channel, patch=patch, in_ch=in_ch,
                         grid_side=grid_side, fusing_ratios=fusing_ratios,
                         class_num=class_num)

    fwd = jax.jit(functools.partial(clip_dualist_forward, patch=patch,
                                    fusing_ratios=fusing_ratios,
                                    class_num=class_num))
    pred = fwd(x, params)
    pred = jax.block_until_ready(pred)
    assert pred.shape == (b, class_num), pred.shape
    assert bool(jnp.all(jnp.isfinite(pred))), "non-finite output"
    print("KERNEL_OK")
</pallas_src>

<mosaic_0001>
module attributes {stable_mosaic.version = 11 : i64} {
  func.func @_patch_embed_ln_kernel(%arg0: i32, %arg1: i32, %arg2: memref<64x192xbf16, #tpu.memory_space<vmem>>, %arg3: memref<192x128xbf16, #tpu.memory_space<vmem>>, %arg4: memref<1x128xf32, #tpu.memory_space<vmem>>, %arg5: memref<16x128xf32, #tpu.memory_space<vmem>>, %arg6: memref<1x128xf32, #tpu.memory_space<vmem>>, %arg7: memref<1x128xf32, #tpu.memory_space<vmem>>, %arg8: memref<64x128xbf16, #tpu.memory_space<vmem>>, %arg9: memref<1x8x128xf32, #tpu.memory_space<vmem>>) attributes {dimension_semantics = [#tpu.dimension_semantics<parallel>, #tpu.dimension_semantics<arbitrary>], iteration_bounds = array<i64: 2, 1>, scalar_prefetch = 0 : i64, scratch_operands = 0 : i64, tpu.core_type = #tpu.core_type<tc>, window_params = [{transform_indices = @transform_0, window_bounds = array<i64: 64, 192>}, {pipeline_mode = #tpu.pipeline_mode<synchronous>, transform_indices = @transform_1, window_bounds = array<i64: 192, 128>}, {pipeline_mode = #tpu.pipeline_mode<synchronous>, transform_indices = @transform_2, window_bounds = array<i64: 1, 128>}, {pipeline_mode = #tpu.pipeline_mode<synchronous>, transform_indices = @transform_3, window_bounds = array<i64: 16, 128>}, {pipeline_mode = #tpu.pipeline_mode<synchronous>, transform_indices = @transform_4, window_bounds = array<i64: 1, 128>}, {pipeline_mode = #tpu.pipeline_mode<synchronous>, transform_indices = @transform_5, window_bounds = array<i64: 1, 128>}, {transform_indices = @transform_6, window_bounds = array<i64: 64, 128>}, {transform_indices = @transform_7, window_bounds = array<i64: 1, 8, 128>}]} {
    %c0 = arith.constant 0 : index
    %c0_0 = arith.constant 0 : index
    %0 = vector.load %arg2[%c0, %c0_0] : memref<64x192xbf16, #tpu.memory_space<vmem>>, vector<64x192xbf16>
    %c0_1 = arith.constant 0 : index
    %c0_2 = arith.constant 0 : index
    %1 = vector.load %arg3[%c0_1, %c0_2] : memref<192x128xbf16, #tpu.memory_space<vmem>>, vector<192x128xbf16>
    %cst = arith.constant dense<0.000000e+00> : vector<64x128xf32>
    %2 = tpu.matmul %0, %1, %cst {dimension_numbers = #tpu.dot_dimension_numbers<[1], [0], [0], [1], [0, 0, 1, 1], [], []>} : vector<64x192xbf16>, vector<192x128xbf16>, vector<64x128xf32> -> vector<64x128xf32>
    %c0_3 = arith.constant 0 : index
    %c0_4 = arith.constant 0 : index
    %3 = vector.load %arg5[%c0_3, %c0_4] : memref<16x128xf32, #tpu.memory_space<vmem>>, vector<16x128xf32>
    %4 = tpu.concatenate %3, %3, %3, %3 in 0 : vector<16x128xf32>, vector<16x128xf32>, vector<16x128xf32>, vector<16x128xf32> -> vector<64x128xf32>
    %c0_5 = arith.constant 0 : index
    %c0_6 = arith.constant 0 : index
    %5 = vector.load %arg4[%c0_5, %c0_6] : memref<1x128xf32, #tpu.memory_space<vmem>>, vector<1x128xf32>
    %6 = vector.broadcast %5 : vector<1x128xf32> to vector<64x128xf32>
    %7 = arith.addf %2, %6 : vector<64x128xf32>
    %8 = arith.addf %7, %4 : vector<64x128xf32>
    %cst_7 = arith.constant dense<0.000000e+00> : vector<64xf32>
    %9 = vector.multi_reduction <add>, %8, %cst_7 [1] : vector<64x128xf32> to vector<64xf32>
    %10 = vector.shape_cast %9 : vector<64xf32> to vector<64x1xf32>
    %cst_8 = arith.constant 1.280000e+02 : f32
    %11 = vector.broadcast %cst_8 : f32 to vector<64x1xf32>
    %12 = arith.divf %10, %11 : vector<64x1xf32>
    %13 = vector.broadcast %12 : vector<64x1xf32> to vector<64x128xf32>
    %14 = arith.subf %8, %13 : vector<64x128xf32>
    %15 = arith.mulf %14, %14 : vector<64x128xf32>
    %cst_9 = arith.constant dense<0.000000e+00> : vector<64xf32>
    %16 = vector.multi_reduction <add>, %15, %cst_9 [1] : vector<64x128xf32> to vector<64xf32>
    %17 = vector.shape_cast %16 : vector<64xf32> to vector<64x1xf32>
    %cst_10 = arith.constant 1.280000e+02 : f32
    %18 = vector.broadcast %cst_10 : f32 to vector<64x1xf32>
    %19 = arith.divf %17, %18 : vector<64x1xf32>
    %20 = vector.broadcast %12 : vector<64x1xf32> to vector<64x128xf32>
    %21 = arith.subf %8, %20 : vector<64x128xf32>
    %cst_11 = arith.constant 9.99999974E-6 : f32
    %22 = vector.broadcast %cst_11 : f32 to vector<64x1xf32>
    %23 = arith.addf %19, %22 : vector<64x1xf32>
    %24 = math.rsqrt %23 : vector<64x1xf32>
    %25 = vector.broadcast %24 : vector<64x1xf32> to vector<64x128xf32>
    %26 = arith.mulf %21, %25 : vector<64x128xf32>
    %c0_12 = arith.constant 0 : index
    %c0_13 = arith.constant 0 : index
    %27 = vector.load %arg6[%c0_12, %c0_13] : memref<1x128xf32, #tpu.memory_space<vmem>>, vector<1x128xf32>
    %28 = vector.broadcast %27 : vector<1x128xf32> to vector<64x128xf32>
    %29 = arith.mulf %26, %28 : vector<64x128xf32>
    %c0_14 = arith.constant 0 : index
    %c0_15 = arith.constant 0 : index
    %30 = vector.load %arg7[%c0_14, %c0_15] : memref<1x128xf32, #tpu.memory_space<vmem>>, vector<1x128xf32>
    %31 = vector.broadcast %30 : vector<1x128xf32> to vector<64x128xf32>
    %32 = arith.addf %29, %31 : vector<64x128xf32>
    %33 = arith.truncf %32 : vector<64x128xf32> to vector<64x128xbf16>
    %c0_16 = arith.constant 0 : index
    %c0_17 = arith.constant 0 : index
    %34 = vector.load %arg8[%c0_16, %c0_17] : memref<64x128xbf16, #tpu.memory_space<vmem>>, vector<64x128xbf16>
    tpu.vector_store %arg8[%c0_16, %c0_17], %33 {strides = array<i32>} : memref<64x128xbf16, #tpu.memory_space<vmem>>, vector<64x128xbf16>,
    %c0_i32 = arith.constant 0 : i32
    %35 = arith.cmpi eq, %arg1, %c0_i32 : i32
    %36 = arith.extui %35 : i1 to i32
    %c0_i32_18 = arith.constant 0 : i32
    %37 = arith.cmpi ne, %36, %c0_i32_18 : i32
    scf.if %37 {
      %cst_26 = arith.constant 0.000000e+00 : f32
      %44 = vector.broadcast %cst_26 : f32 to vector<1x8x128xf32>
      %c0_27 = arith.constant 0 : index
      %c0_28 = arith.constant 0 : index
      %c0_29 = arith.constant 0 : index
      %45 = vector.load %arg9[%c0_27, %c0_28, %c0_29] : memref<1x8x128xf32, #tpu.memory_space<vmem>>, vector<1x8x128xf32>
      tpu.vector_store %arg9[%c0_27, %c0_28, %c0_29], %44 {strides = array<i32>} : memref<1x8x128xf32, #tpu.memory_space<vmem>>, vector<1x8x128xf32>,
    } else {
    }
    %cst_19 = arith.constant dense<0.000000e+00> : vector<128xf32>
    %38 = vector.multi_reduction <add>, %32, %cst_19 [0] : vector<64x128xf32> to vector<128xf32>
    %c0_20 = arith.constant 0 : index
    %c0_21 = arith.constant 0 : index
    %c0_22 = arith.constant 0 : index
    %39 = vector.load %arg9[%c0_20, %c0_21, %c0_22] : memref<1x8x128xf32, #tpu.memory_space<vmem>>, vector<1x8x128xf32>
    %40 = vector.shape_cast %38 : vector<128xf32> to vector<1x1x128xf32>
    %41 = vector.broadcast %40 : vector<1x1x128xf32> to vector<1x8x128xf32>
    %42 = arith.addf %39, %41 : vector<1x8x128xf32>
    %c0_23 = arith.constant 0 : index
    %c0_24 = arith.constant 0 : index
    %c0_25 = arith.constant 0 : index
    %43 = vector.load %arg9[%c0_23, %c0_24, %c0_25] : memref<1x8x128xf32, #tpu.memory_space<vmem>>, vector<1x8x128xf32>
    tpu.vector_store %arg9[%c0_23, %c0_24, %c0_25], %42 {strides = array<i32>} : memref<1x8x128xf32, #tpu.memory_space<vmem>>, vector<1x8x128xf32>,
    return
  }
  func.func @transform_0(%arg0: i32, %arg1: i32) -> (i32, i32) {
    %c1_i32 = arith.constant 1 : i32
    %0 = arith.muli %arg0, %c1_i32 : i32
    %1 = arith.addi %0, %arg1 : i32
    %c0_i32 = arith.constant 0 : i32
    %c0_i32_0 = arith.constant 0 : i32
    return %1, %c0_i32 : i32, i32
  }
  func.func @transform_1(%arg0: i32, %arg1: i32) -> (i32, i32) {
    %c0_i32 = arith.constant 0 : i32
    %c0_i32_0 = arith.constant 0 : i32
    %c0_i32_1 = arith.constant 0 : i32
    return %c0_i32, %c0_i32_0 : i32, i32
  }
  func.func @transform_2(%arg0: i32, %arg1: i32) -> (i32, i32) {
    %c0_i32 = arith.constant 0 : i32
    %c0_i32_0 = arith.constant 0 : i32
    %c0_i32_1 = arith.constant 0 : i32
    return %c0_i32, %c0_i32_0 : i32, i32
  }
  func.func @transform_3(%arg0: i32, %arg1: i32) -> (i32, i32) {
    %c0_i32 = arith.constant 0 : i32
    %c0_i32_0 = arith.constant 0 : i32
    %c0_i32_1 = arith.constant 0 : i32
    return %c0_i32, %c0_i32_0 : i32, i32
  }
  func.func @transform_4(%arg0: i32, %arg1: i32) -> (i32, i32) {
    %c0_i32 = arith.constant 0 : i32
    %c0_i32_0 = arith.constant 0 : i32
    %c0_i32_1 = arith.constant 0 : i32
    return %c0_i32, %c0_i32_0 : i32, i32
  }
  func.func @transform_5(%arg0: i32, %arg1: i32) -> (i32, i32) {
    %c0_i32 = arith.constant 0 : i32
    %c0_i32_0 = arith.constant 0 : i32
    %c0_i32_1 = arith.constant 0 : i32
    return %c0_i32, %c0_i32_0 : i32, i32
  }
  func.func @transform_6(%arg0: i32, %arg1: i32) -> (i32, i32) {
    %c1_i32 = arith.constant 1 : i32
    %0 = arith.muli %arg0, %c1_i32 : i32
    %1 = arith.addi %0, %arg1 : i32
    %c0_i32 = arith.constant 0 : i32
    %c0_i32_0 = arith.constant 0 : i32
    return %1, %c0_i32 : i32, i32
  }
  func.func @transform_7(%arg0: i32, %arg1: i32) -> (i32, i32, i32) {
    %c0_i32 = arith.constant 0 : i32
    %c0_i32_0 = arith.constant 0 : i32
    %c0_i32_1 = arith.constant 0 : i32
    return %arg0, %c0_i32, %c0_i32_0 : i32, i32, i32
  }
}

module attributes {stable_mosaic.version = 11 : i64} {
  func.func @_dualist_mean_kernel(%arg0: i32, %arg1: memref<64x128xbf16, #tpu.memory_space<vmem>>, %arg2: memref<1x128xf32, #tpu.memory_space<vmem>>, %arg3: memref<1x128xf32, #tpu.memory_space<vmem>>, %arg4: memref<128x256xbf16, #tpu.memory_space<vmem>>, %arg5: memref<1x256xf32, #tpu.memory_space<vmem>>, %arg6: memref<256x128xbf16, #tpu.memory_space<vmem>>, %arg7: memref<1x128xf32, #tpu.memory_space<vmem>>, %arg8: memref<4x8x128xf32, #tpu.memory_space<vmem>>) attributes {dimension_semantics = [#tpu.dimension_semantics<parallel>], iteration_bounds = array<i64: 2>, scalar_prefetch = 0 : i64, scratch_operands = 0 : i64, tpu.core_type = #tpu.core_type<tc>, window_params = [{transform_indices = @transform_0, window_bounds = array<i64: 64, 128>}, {pipeline_mode = #tpu.pipeline_mode<synchronous>, transform_indices = @transform_1, window_bounds = array<i64: 1, 128>}, {pipeline_mode = #tpu.pipeline_mode<synchronous>, transform_indices = @transform_2, window_bounds = array<i64: 1, 128>}, {pipeline_mode = #tpu.pipeline_mode<synchronous>, transform_indices = @transform_3, window_bounds = array<i64: 128, 256>}, {pipeline_mode = #tpu.pipeline_mode<synchronous>, transform_indices = @transform_4, window_bounds = array<i64: 1, 256>}, {pipeline_mode = #tpu.pipeline_mode<synchronous>, transform_indices = @transform_5, window_bounds = array<i64: 256, 128>}, {pipeline_mode = #tpu.pipeline_mode<synchronous>, transform_indices = @transform_6, window_bounds = array<i64: 1, 128>}, {transform_indices = @transform_7, window_bounds = array<i64: 4, 8, 128>}]} {
    %c0 = arith.constant 0 : index
    %c0_0 = arith.constant 0 : index
    %0 = vector.load %arg1[%c0, %c0_0] : memref<64x128xbf16, #tpu.memory_space<vmem>>, vector<64x128xbf16>
    %1 = arith.extf %0 : vector<64x128xbf16> to vector<64x128xf32>
    %cst = arith.constant dense<0.000000e+00> : vector<64xf32>
    %2 = vector.multi_reduction <add>, %1, %cst [1] : vector<64x128xf32> to vector<64xf32>
    %3 = vector.shape_cast %2 : vector<64xf32> to vector<64x1xf32>
    %cst_1 = arith.constant 1.280000e+02 : f32
    %4 = vector.broadcast %cst_1 : f32 to vector<64x1xf32>
    %5 = arith.divf %3, %4 : vector<64x1xf32>
    %6 = vector.broadcast %5 : vector<64x1xf32> to vector<64x128xf32>
    %7 = arith.subf %1, %6 : vector<64x128xf32>
    %8 = arith.mulf %7, %7 : vector<64x128xf32>
    %cst_2 = arith.constant dense<0.000000e+00> : vector<64xf32>
    %9 = vector.multi_reduction <add>, %8, %cst_2 [1] : vector<64x128xf32> to vector<64xf32>
    %10 = vector.shape_cast %9 : vector<64xf32> to vector<64x1xf32>
    %cst_3 = arith.constant 1.280000e+02 : f32
    %11 = vector.broadcast %cst_3 : f32 to vector<64x1xf32>
    %12 = arith.divf %10, %11 : vector<64x1xf32>
    %13 = vector.broadcast %5 : vector<64x1xf32> to vector<64x128xf32>
    %14 = arith.subf %1, %13 : vector<64x128xf32>
    %cst_4 = arith.constant 9.99999974E-6 : f32
    %15 = vector.broadcast %cst_4 : f32 to vector<64x1xf32>
    %16 = arith.addf %12, %15 : vector<64x1xf32>
    %17 = math.rsqrt %16 : vector<64x1xf32>
    %18 = vector.broadcast %17 : vector<64x1xf32> to vector<64x128xf32>
    %19 = arith.mulf %14, %18 : vector<64x128xf32>
    %c0_5 = arith.constant 0 : index
    %c0_6 = arith.constant 0 : index
    %20 = vector.load %arg2[%c0_5, %c0_6] : memref<1x128xf32, #tpu.memory_space<vmem>>, vector<1x128xf32>
    %21 = vector.broadcast %20 : vector<1x128xf32> to vector<64x128xf32>
    %22 = arith.mulf %19, %21 : vector<64x128xf32>
    %c0_7 = arith.constant 0 : index
    %c0_8 = arith.constant 0 : index
    %23 = vector.load %arg3[%c0_7, %c0_8] : memref<1x128xf32, #tpu.memory_space<vmem>>, vector<1x128xf32>
    %24 = vector.broadcast %23 : vector<1x128xf32> to vector<64x128xf32>
    %25 = arith.addf %22, %24 : vector<64x128xf32>
    %26 = arith.truncf %25 : vector<64x128xf32> to vector<64x128xbf16>
    %c0_9 = arith.constant 0 : index
    %c0_10 = arith.constant 0 : index
    %27 = vector.load %arg4[%c0_9, %c0_10] : memref<128x256xbf16, #tpu.memory_space<vmem>>, vector<128x256xbf16>
    %cst_11 = arith.constant dense<0.000000e+00> : vector<64x256xf32>
    %28 = tpu.matmul %26, %27, %cst_11 {dimension_numbers = #tpu.dot_dimension_numbers<[1], [0], [0], [1], [0, 0, 1, 1], [], []>} : vector<64x128xbf16>, vector<128x256xbf16>, vector<64x256xf32> -> vector<64x256xf32>
    %c0_12 = arith.constant 0 : index
    %c0_13 = arith.constant 0 : index
    %29 = vector.load %arg5[%c0_12, %c0_13] : memref<1x256xf32, #tpu.memory_space<vmem>>, vector<1x256xf32>
    %30 = vector.broadcast %29 : vector<1x256xf32> to vector<64x256xf32>
    %31 = arith.addf %28, %30 : vector<64x256xf32>
    %32 = arith.mulf %31, %31 : vector<64x256xf32>
    %33 = arith.mulf %31, %32 : vector<64x256xf32>
    %cst_14 = arith.constant 4.471500e-02 : f32
    %34 = vector.broadcast %cst_14 : f32 to vector<64x256xf32>
    %35 = arith.mulf %34, %33 : vector<64x256xf32>
    %36 = arith.addf %31, %35 : vector<64x256xf32>
    %cst_15 = arith.constant 0.797884583 : f32
    %37 = vector.broadcast %cst_15 : f32 to vector<64x256xf32>
    %38 = arith.mulf %37, %36 : vector<64x256xf32>
    %39 = math.tanh %38 : vector<64x256xf32>
    %cst_16 = arith.constant 1.000000e+00 : f32
    %40 = vector.broadcast %cst_16 : f32 to vector<64x256xf32>
    %41 = arith.addf %40, %39 : vector<64x256xf32>
    %cst_17 = arith.constant 5.000000e-01 : f32
    %42 = vector.broadcast %cst_17 : f32 to vector<64x256xf32>
    %43 = arith.mulf %42, %41 : vector<64x256xf32>
    %44 = arith.mulf %31, %43 : vector<64x256xf32>
    %45 = arith.truncf %44 : vector<64x256xf32> to vector<64x256xbf16>
    %c0_18 = arith.constant 0 : index
    %c0_19 = arith.constant 0 : index
    %46 = vector.load %arg6[%c0_18, %c0_19] : memref<256x128xbf16, #tpu.memory_space<vmem>>, vector<256x128xbf16>
    %cst_20 = arith.constant dense<0.000000e+00> : vector<64x128xf32>
    %47 = tpu.matmul %45, %46, %cst_20 {dimension_numbers = #tpu.dot_dimension_numbers<[1], [0], [0], [1], [0, 0, 1, 1], [], []>} : vector<64x256xbf16>, vector<256x128xbf16>, vector<64x128xf32> -> vector<64x128xf32>
    %48 = arith.addf %1, %47 : vector<64x128xf32>
    %c0_21 = arith.constant 0 : index
    %c0_22 = arith.constant 0 : index
    %49 = vector.load %arg7[%c0_21, %c0_22] : memref<1x128xf32, #tpu.memory_space<vmem>>, vector<1x128xf32>
    %50 = vector.broadcast %49 : vector<1x128xf32> to vector<64x128xf32>
    %51 = arith.addf %48, %50 : vector<64x128xf32>
    %52 = vector.shape_cast %51 : vector<64x128xf32> to vector<4x16x128xf32>
    %cst_23 = arith.constant dense<0.000000e+00> : vector<4x128xf32>
    %53 = vector.multi_reduction <add>, %52, %cst_23 [1] : vector<4x16x128xf32> to vector<4x128xf32>
    %cst_24 = arith.constant 1.600000e+01 : f32
    %54 = vector.broadcast %cst_24 : f32 to vector<4x128xf32>
    %55 = arith.divf %53, %54 : vector<4x128xf32>
    %56 = vector.shape_cast %55 : vector<4x128xf32> to vector<4x1x128xf32>
    %57 = vector.shape_cast %56 : vector<4x1x128xf32> to vector<4x1x128xf32>
    %58 = vector.broadcast %57 : vector<4x1x128xf32> to vector<4x8x128xf32>
    %c0_25 = arith.constant 0 : index
    %c0_26 = arith.constant 0 : index
    %c0_27 = arith.constant 0 : index
    %59 = vector.load %arg8[%c0_25, %c0_26, %c0_27] : memref<4x8x128xf32, #tpu.memory_space<vmem>>, vector<4x8x128xf32>
    tpu.vector_store %arg8[%c0_25, %c0_26, %c0_27], %58 {strides = array<i32>} : memref<4x8x128xf32, #tpu.memory_space<vmem>>, vector<4x8x128xf32>,
    return
  }
  func.func @transform_0(%arg0: i32) -> (i32, i32) {
    %c0_i32 = arith.constant 0 : i32
    %c0_i32_0 = arith.constant 0 : i32
    return %arg0, %c0_i32 : i32, i32
  }
  func.func @transform_1(%arg0: i32) -> (i32, i32) {
    %c0_i32 = arith.constant 0 : i32
    %c0_i32_0 = arith.constant 0 : i32
    %c0_i32_1 = arith.constant 0 : i32
    return %c0_i32, %c0_i32_0 : i32, i32
  }
  func.func @transform_2(%arg0: i32) -> (i32, i32) {
    %c0_i32 = arith.constant 0 : i32
    %c0_i32_0 = arith.constant 0 : i32
    %c0_i32_1 = arith.constant 0 : i32
    return %c0_i32, %c0_i32_0 : i32, i32
  }
  func.func @transform_3(%arg0: i32) -> (i32, i32) {
    %c0_i32 = arith.constant 0 : i32
    %c0_i32_0 = arith.constant 0 : i32
    %c0_i32_1 = arith.constant 0 : i32
    return %c0_i32, %c0_i32_0 : i32, i32
  }
  func.func @transform_4(%arg0: i32) -> (i32, i32) {
    %c0_i32 = arith.constant 0 : i32
    %c0_i32_0 = arith.constant 0 : i32
    %c0_i32_1 = arith.constant 0 : i32
    return %c0_i32, %c0_i32_0 : i32, i32
  }
  func.func @transform_5(%arg0: i32) -> (i32, i32) {
    %c0_i32 = arith.constant 0 : i32
    %c0_i32_0 = arith.constant 0 : i32
    %c0_i32_1 = arith.constant 0 : i32
    return %c0_i32, %c0_i32_0 : i32, i32
  }
  func.func @transform_6(%arg0: i32) -> (i32, i32) {
    %c0_i32 = arith.constant 0 : i32
    %c0_i32_0 = arith.constant 0 : i32
    %c0_i32_1 = arith.constant 0 : i32
    return %c0_i32, %c0_i32_0 : i32, i32
  }
  func.func @transform_7(%arg0: i32) -> (i32, i32, i32) {
    %c0_i32 = arith.constant 0 : i32
    %c0_i32_0 = arith.constant 0 : i32
    %c0_i32_1 = arith.constant 0 : i32
    return %arg0, %c0_i32, %c0_i32_0 : i32, i32, i32
  }
}

module attributes {stable_mosaic.version = 11 : i64} {
  func.func @_fc1_kernel(%arg0: i32, %arg1: memref<8x640xf32, #tpu.memory_space<vmem>>, %arg2: memref<640x128xf32, #tpu.memory_space<vmem>>, %arg3: memref<1x128xf32, #tpu.memory_space<vmem>>, %arg4: memref<8x128xf32, #tpu.memory_space<vmem>>) attributes {dimension_semantics = [#tpu.dimension_semantics<arbitrary>], iteration_bounds = array<i64: 1>, scalar_prefetch = 0 : i64, scratch_operands = 0 : i64, tpu.core_type = #tpu.core_type<tc>, window_params = [{pipeline_mode = #tpu.pipeline_mode<synchronous>, transform_indices = @transform_0, window_bounds = array<i64: 8, 640>}, {pipeline_mode = #tpu.pipeline_mode<synchronous>, transform_indices = @transform_1, window_bounds = array<i64: 640, 128>}, {pipeline_mode = #tpu.pipeline_mode<synchronous>, transform_indices = @transform_2, window_bounds = array<i64: 1, 128>}, {pipeline_mode = #tpu.pipeline_mode<synchronous>, transform_indices = @transform_3, window_bounds = array<i64: 8, 128>}]} {
    %c0 = arith.constant 0 : index
    %c0_0 = arith.constant 0 : index
    %0 = vector.load %arg1[%c0, %c0_0] : memref<8x640xf32, #tpu.memory_space<vmem>>, vector<8x640xf32>
    %c0_1 = arith.constant 0 : index
    %c0_2 = arith.constant 0 : index
    %1 = vector.load %arg2[%c0_1, %c0_2] : memref<640x128xf32, #tpu.memory_space<vmem>>, vector<640x128xf32>
    %cst = arith.constant dense<0.000000e+00> : vector<8x128xf32>
    %2 = tpu.matmul %0, %1, %cst {dimension_numbers = #tpu.dot_dimension_numbers<[1], [0], [0], [1], [0, 0, 1, 1], [], []>} : vector<8x640xf32>, vector<640x128xf32>, vector<8x128xf32> -> vector<8x128xf32>
    %c0_3 = arith.constant 0 : index
    %c0_4 = arith.constant 0 : index
    %3 = vector.load %arg3[%c0_3, %c0_4] : memref<1x128xf32, #tpu.memory_space<vmem>>, vector<1x128xf32>
    %4 = vector.broadcast %3 : vector<1x128xf32> to vector<8x128xf32>
    %5 = arith.addf %2, %4 : vector<8x128xf32>
    %c0_5 = arith.constant 0 : index
    %c0_6 = arith.constant 0 : index
    %6 = vector.load %arg4[%c0_5, %c0_6] : memref<8x128xf32, #tpu.memory_space<vmem>>, vector<8x128xf32>
    tpu.vector_store %arg4[%c0_5, %c0_6], %5 {strides = array<i32>} : memref<8x128xf32, #tpu.memory_space<vmem>>, vector<8x128xf32>,
    return
  }
  func.func @transform_0(%arg0: i32) -> (i32, i32) {
    %c0_i32 = arith.constant 0 : i32
    %c0_i32_0 = arith.constant 0 : i32
    %c0_i32_1 = arith.constant 0 : i32
    return %c0_i32, %c0_i32_0 : i32, i32
  }
  func.func @transform_1(%arg0: i32) -> (i32, i32) {
    %c0_i32 = arith.constant 0 : i32
    %c0_i32_0 = arith.constant 0 : i32
    %c0_i32_1 = arith.constant 0 : i32
    return %c0_i32, %c0_i32_0 : i32, i32
  }
  func.func @transform_2(%arg0: i32) -> (i32, i32) {
    %c0_i32 = arith.constant 0 : i32
    %c0_i32_0 = arith.constant 0 : i32
    %c0_i32_1 = arith.constant 0 : i32
    return %c0_i32, %c0_i32_0 : i32, i32
  }
  func.func @transform_3(%arg0: i32) -> (i32, i32) {
    %c0_i32 = arith.constant 0 : i32
    %c0_i32_0 = arith.constant 0 : i32
    %c0_i32_1 = arith.constant 0 : i32
    return %c0_i32, %c0_i32_0 : i32, i32
  }
}

</mosaic_0001>

<bundles_post_ra>
// kernel: clip_dualist_forward.3
= control target key start
LH: loop header
LB: loop body
LE: loop exit
PB: predicated region body
PF: predicated region fallthrough
CT: control target
= control target key end

     0   :  { %s1070_s24 = smov 0   ;;  %s1072_s25 = smov 0   ;;  %s1250_s0 = inlined_call_operand.vmem [shape: bf16[128,192], index: 0, kind: input, shape index: {}]   ;;  %s1251_s1 = inlined_call_operand.vmem [shape: bf16[192,128], index: 1, kind: input, shape index: {}]   ;;  %s1252_s2 = inlined_call_operand.vmem [shape: f32[1,128], index: 2, kind: input, shape index: {}]   ;;  %s1253_s3 = inlined_call_operand.vmem [shape: f32[16,128], index: 3, kind: input, shape index: {}]   ;;  %s1254_s4 = inlined_call_operand.vmem [shape: f32[1,128], index: 4, kind: input, shape index: {}]   ;;  %s1255_s5 = inlined_call_operand.vmem [shape: f32[1,128], index: 5, kind: input, shape index: {}]   ;;  %s1256_s6 = inlined_call_operand.vmem [shape: bf16[128,128], index: 6, kind: output, shape index: {0}]   ;;  %s1257_s7 = inlined_call_operand.vmem [shape: f32[2,8,128], index: 7, kind: output, shape index: {1}]  }
   0x1   :  { %s1074_s26 = smov 0  }
   0x2 LB: > { %s30_s27 = sadd.s32 1, %s1023_s25  ;;  %p839_p0 = scmp.ge.s32.totalorder %s1027_s26, 1  ;;  %s1027_s26 = sphi %s1074_s26, %s18_s26   ;;  %s1023_s25 = sphi %s1072_s25, %s1259_s25   ;;  %s1019_s24 = sphi %s1070_s24, %s1258_s24  }
   0x3   : > { %p32_p1 = scmp.ge.s32.totalorder %s30_s27, 2  ;;  %p260_p2 = scmp.lt.s32.totalorder %s1027_s26, 3 }
   0x5   : > { %s1261_s27 = smov (%p32_p1, %s30_s27), 0  ;;  %p261_p3 = pnand %p839_p0, %p260_p2 }
   0x6   : > { %s840_s30 = sshll.u32 (!%p261_p3), %s1019_s24, 3  ;;  %p316_p5 = scmp.lt.s32.totalorder (!%p261_p3), %s1019_s24, 1 }
   0x7   : > { %264 = sbr.rel (%p261_p3) target bundleno = 599 (0x257), region = 44  ;;  %p301_p4 = scmp.lt.s32.totalorder (!%p261_p3), %s840_s30, 15 }
   0xc   : > { %v965_v0 = vld [vmem:[%s1251_s1 + $0x38] sm:$0xff]   ;;  %v1029_v1 = vmov 0   ;;  %v966_v2 = vld [vmem:[%s1251_s1 + $0x30] sm:$0xff]   ;;  %s1263_s30 = smov (!%p301_p4, %s840_s30), 15  ;;  %v967_v3 = vld [vmem:[%s1251_s1 + $0x28] sm:$0xff]   ;;  %vm470_vm0 = vcmask 523264  }
   0xd   : > { %483 = vmatprep.subr.bf16.mxu0 %v1029_v1  ;;  %915 = vmatprep.subr.bf16.mxu1 %v1029_v1  ;;  %s883_s12 = sshll.u32 %s1263_s30, 3  ;;  %v968_v4 = vld [vmem:[%s1251_s1 + $0x20] sm:$0xff]   ;;  %v969_v6 = vld [vmem:[%s1251_s1 + $0x18] sm:$0xff]   ;;  %v970_v8 = vld [vmem:[%s1251_s1 + $0x10] sm:$0xff]   ;;  %s844_s8 = sshll.u32 %s1263_s30, 2 }
   0xe   : > { %484 = vmatpush1.bf16.msra.mxu0 %v965_v0  ;;  %927 = vmatpush1.bf16.msra.mxu1 %v965_v0  ;;  %s1115_s17 = scalar_lea.vmem %s1250_s0, %s883_s12  ;;  %v971_v9 = vld [vmem:[%s1251_s1 + $0x8] sm:$0xff]   ;;  %v972_v10 = vld [vmem:[%s1251_s1] sm:$0xff]   ;;  %v973_v11 = vld [vmem:[%s1251_s1 + $0x58] sm:$0xff]   ;;  %s1225_s11 = scalar_lea.vmem %s1256_s6, %s844_s8 }
   0xf   : > { %485 = vmatprep.subr.bf16.mxu0 %v1029_v1  ;;  %916 = vmatprep.subr.bf16.mxu1 %v1029_v1  ;;  %v979_v5 = vld [vmem:[%s1115_s17 + $0x4] ss:$8 sps:$4 sm:$0xff]   ;;  %v974_v12 = vld [vmem:[%s1251_s1 + $0x50] sm:$0xff]   ;;  %v977_v15 = vld [vmem:[%s1115_s17] ss:$8 sps:$4 sm:$0xff]   ;;  %s1265_s24 = smov (!%p316_p5, %s1019_s24), 1 }
  0x10   : > { %v982_v7 = vld [vmem:[%s1115_s17 + $0x24] ss:$8 sps:$4 sm:$0xff]   ;;  %867 = vmatprep.mubr.msk.bf16.mxu0 %vm470_vm0, %v979_v5  ;;  %v980_v16 = vld [vmem:[%s1115_s17 + $0x20] ss:$8 sps:$4 sm:$0xff]   ;;  %v983_v17 = vld [vmem:[%s1115_s17 + $0x14] ss:$8 sps:$4 sm:$0xff]  }
  0x11   : > { %869 = vmatprep.mubr.msk.bf16.mxu1 %vm470_vm0, %v982_v7  ;;  %v975_v13 = vld [vmem:[%s1251_s1 + $0x48] sm:$0xff]   ;;  %v976_v14 = vld [vmem:[%s1251_s1 + $0x40] sm:$0xff]   ;;  %v986_v18 = vld [vmem:[%s1115_s17 + $0x34] ss:$8 sps:$4 sm:$0xff]   ;;  %s845_s30 = sshll.u32 %s1265_s24, 3 }
  0x12   : > { %486 = vmatpush1.bf16.msra.mxu0 %v966_v2  ;;  %928 = vmatpush1.bf16.msra.mxu1 %v966_v2  ;;  %v985_v19 = vld [vmem:[%s1115_s17 + $0x10] ss:$8 sps:$4 sm:$0xff]   ;;  %v846_v21 = vld [vmem:[%s1252_s2] ss:$0 sm:$0xff]  ;;  %v354_v31 = vld [vmem:[%s1253_s3 + $0x8] sm:$0xff]  ;;  %s319_s14 = scalar_lea.vmem %s1257_s7, %s845_s30 }
  0x13   : > { %487 = vmatprep.subr.bf16.mxu0 %v1029_v1  ;;  %917 = vmatprep.subr.bf16.mxu1 %v1029_v1  ;;  %v988_v20 = vld [vmem:[%s1115_s17 + $0x30] ss:$8 sps:$4 sm:$0xff]   ;;  %v353_v24 = vld [vmem:[%s1253_s3] sm:$0xff] }
  0x16   : > { %488 = vmatpush1.bf16.msra.mxu0 %v967_v3  ;;  %929 = vmatpush1.bf16.msra.mxu1 %v967_v3 }
  0x17   : > { %489 = vmatprep.subr.bf16.mxu0 %v1029_v1  ;;  %918 = vmatprep.subr.bf16.mxu1 %v1029_v1 }
  0x1a   : > { %490 = vmatpush1.bf16.msra.mxu0 %v968_v4  ;;  %930 = vmatpush1.bf16.msra.mxu1 %v968_v4 }
  0x1b   : > { %491 = vmatprep.subr.bf16.mxu0 %v1029_v1  ;;  %919 = vmatprep.subr.bf16.mxu1 %v1029_v1 }
  0x1e   : > { %492 = vmatpush1.bf16.msra.mxu0 %v969_v6  ;;  %931 = vmatpush1.bf16.msra.mxu1 %v969_v6 }
  0x1f   : > { %493 = vmatprep.subr.bf16.mxu0 %v1029_v1  ;;  %920 = vmatprep.subr.bf16.mxu1 %v1029_v1 }
  0x22   : > { %494 = vmatpush1.bf16.msra.mxu0 %v970_v8  ;;  %932 = vmatpush1.bf16.msra.mxu1 %v970_v8 }
  0x23   : > { %495 = vmatprep.subr.bf16.mxu0 %v1029_v1  ;;  %921 = vmatprep.subr.bf16.mxu1 %v1029_v1 }
  0x26   : > { %496 = vmatpush1.bf16.msra.mxu0 %v971_v9  ;;  %933 = vmatpush1.bf16.msra.mxu1 %v971_v9 }
  0x27   : > { %497 = vmatprep.subr.bf16.mxu0 %v1029_v1  ;;  %922 = vmatprep.subr.bf16.mxu1 %v1029_v1 }
  0x2a   : > { %498 = vmatpush1.bf16.msra.mxu0 %v972_v10  ;;  %934 = vmatpush1.bf16.msra.mxu1 %v972_v10 }
  0x2b   : > { %507 = vmatprep.subr.bf16.mxu0 %v1029_v1  ;;  %923 = vmatprep.subr.bf16.mxu1 %v1029_v1 }
  0x2e   : > { %508 = vmatpush2.bf16.msra.mxu0 %v973_v11  ;;  %935 = vmatpush2.bf16.msra.mxu1 %v973_v11 }
  0x2f   : > { %509 = vmatprep.subr.bf16.mxu0 %v1029_v1  ;;  %924 = vmatprep.subr.bf16.mxu1 %v1029_v1 }
  0x32   : > { %510 = vmatpush2.bf16.msra.mxu0 %v974_v12  ;;  %936 = vmatpush2.bf16.msra.mxu1 %v974_v12 }
  0x33   : > { %511 = vmatprep.subr.bf16.mxu0 %v1029_v1  ;;  %925 = vmatprep.subr.bf16.mxu1 %v1029_v1 }
  0x36   : > { %512 = vmatpush2.bf16.msra.mxu0 %v975_v13  ;;  %937 = vmatpush2.bf16.msra.mxu1 %v975_v13 }
  0x37   : > { %513 = vmatprep.subr.bf16.mxu0 %v1029_v1  ;;  %926 = vmatprep.subr.bf16.mxu1 %v1029_v1 }
  0x3a   : > { %514 = vmatpush2.bf16.msra.mxu0 %v976_v14  ;;  %938 = vmatpush2.bf16.msra.mxu1 %v976_v14 }
  0x3d   : > { %516 = vmatmul.mubr.bf16.vlgmr.msra.gmra.mxu0 %v977_v15  ;;  %532 = vmatmul.mubr.bf16.vlgmr.msra.gmra.mxu1 %v980_v16 }
  0x3e   : > { %868 = vmatprep.mubr.msk.bf16.mxu0 %vm470_vm0, %v983_v17  ;;  %870 = vmatprep.mubr.msk.bf16.mxu1 %vm470_vm0, %v986_v18 }
  0x45   : > { %524 = vmatmul.mubr.bf16.gmra.mxu0 %v985_v19  ;;  %540 = vmatmul.mubr.bf16.gmra.mxu1 %v988_v20 }
  0xfd   : > { %v517_v22 = vpop.f32.mrf.mxu0  ;;  %v533_v23 = vpop.f32.mrf.mxu1 }
  0xfe   : > { %v518_v25 = vadd.f32 %v846_v21, %v517_v22  ;;  %v534_v32 = vadd.f32 %v846_v21, %v533_v23 }
  0xff   : > { %v519_v26 = vpop.f32.mrf.mxu0  ;;  %v535_v27 = vpop.f32.mrf.mxu1 }
 0x100   : > { %v548_v28 = vadd.f32 %v518_v25, %v353_v24  ;;  %v552_v41 = vadd.f32 %v534_v32, %v353_v24 }
 0x101   : > { %v520_v29 = vpop.f32.mrf.mxu0  ;;  %v536_v30 = vpop.f32.mrf.mxu1 }
 0x102   : > { %v521_v33 = vadd.f32 %v846_v21, %v520_v29  ;;  %556 = vadd.xlane.f32.xlu0 %v548_v28  ;;  %v537_v51 = vadd.f32 %v846_v21, %v536_v30 }
 0x103   : > { %v522_v34 = vpop.f32.mrf.mxu0  ;;  %v538_v35 = vpop.f32.mrf.mxu1 }
 0x104   : > { %v549_v36 = vadd.f32 %v521_v33, %v354_v31  ;;  %v553_v54 = vadd.f32 %v537_v51, %v354_v31 }
 0x105   : > { %v525_v37 = vpop.f32.mrf.mxu0  ;;  %v541_v38 = vpop.f32.mrf.mxu1 }
 0x106   : > { %v526_v39 = vadd.f32 %v846_v21, %v525_v37  ;;  %558 = vadd.xlane.f32.xlu0 %v549_v36  ;;  %v542_v40 = vadd.f32 %v846_v21, %v541_v38 }
 0x107   : > { %v527_v42 = vpop.f32.mrf.mxu0  ;;  %v543_v43 = vpop.f32.mrf.mxu1 }
 0x108   : > { %v550_v44 = vadd.f32 %v526_v39, %v353_v24  ;;  %v554_v48 = vadd.f32 %v542_v40, %v353_v24 }
 0x109   : > { %v528_v45 = vpop.f32.mrf.mxu0  ;;  %v544_v46 = vpop.f32.mrf.mxu1 }
 0x10a   : > { %v529_v47 = vadd.f32 %v846_v21, %v528_v45  ;;  %560 = vadd.xlane.f32.xlu1 %v550_v44  ;;  %564 = vadd.xlane.f32.xlu0 %v552_v41  ;;  %v545_v53 = vadd.f32 %v846_v21, %v544_v46 }
 0x10b   : > { %v530_v49 = vpop.f32.mrf.mxu0  ;;  %v546_v50 = vpop.f32.mrf.mxu1 }
 0x10c   : > { %v551_v52 = vadd.f32 %v529_v47, %v354_v31  ;;  %v555_v55 = vadd.f32 %v545_v53, %v354_v31  ;;  %v871_v47 = vld [vmem:[%s1254_s4] ss:$0 sm:$0xff] }
 0x10e   : > { %562 = vadd.xlane.f32.xlu1 %v551_v52  ;;  %568 = vadd.xlane.f32.xlu0 %v554_v48 }
 0x112   : > { %566 = vadd.xlane.f32.xlu1 %v553_v54 }
 0x116   : > { %570 = vadd.xlane.f32.xlu1 %v555_v55 }
 0x18b   : > { %v557_v56 = vpop.xlane.xlu0 %556 }
 0x18c   : > { %v573_v57 = vmul.f32 0.0078125, %v557_v56 }
 0x18e   : > { %v1180_v58 = vsub.f32 %v548_v28, %v573_v57 }
 0x18f   : > { %v559_v59 = vpop.xlane.xlu0 %558 }
 0x190   : > { %v574_v60 = vmul.f32 0.0078125, %v559_v59  ;;  %v589_v61 = vmul.f32 %v1180_v58, %v1180_v58 }
 0x192   : > { %v1184_v62 = vsub.f32 %v549_v36, %v574_v60  ;;  %597 = vadd.xlane.f32.xlu0 %v589_v61 }
 0x193   : > { %v561_v63 = vpop.xlane.xlu1 %560  ;;  %v565_v0 = vpop.xlane.xlu0 %564 }
 0x194   : > { %v575_v1 = vmul.f32 0.0078125, %v561_v63  ;;  %v577_v2 = vmul.f32 0.0078125, %v565_v0  ;;  %v590_v3 = vmul.f32 %v1184_v62, %v1184_v62 }
 0x196   : > { %v1188_v4 = vsub.f32 %v550_v44, %v575_v1  ;;  %599 = vadd.xlane.f32.xlu1 %v590_v3  ;;  %v1190_v7 = vsub.f32 %v552_v41, %v577_v2 }
 0x197   : > { %v563_v5 = vpop.xlane.xlu1 %562  ;;  %v569_v6 = vpop.xlane.xlu0 %568 }
 0x198   : > { %v576_v8 = vmul.f32 0.0078125, %v563_v5  ;;  %v579_v9 = vmul.f32 0.0078125, %v569_v6  ;;  %v591_v10 = vmul.f32 %v1188_v4, %v1188_v4  ;;  %v593_v16 = vmul.f32 %v1190_v7, %v1190_v7 }
 0x19a   : > { %v1194_v11 = vsub.f32 %v551_v52, %v576_v8  ;;  %601 = vadd.xlane.f32.xlu0 %v591_v10  ;;  %v1196_v13 = vsub.f32 %v554_v48, %v579_v9 }
 0x19b   : > { %v567_v12 = vpop.xlane.xlu1 %566 }
 0x19c   : > { %v578_v14 = vmul.f32 0.0078125, %v567_v12  ;;  %v592_v15 = vmul.f32 %v1194_v11, %v1194_v11  ;;  %v595_v21 = vmul.f32 %v1196_v13, %v1196_v13 }
 0x19e   : > { %v1202_v17 = vsub.f32 %v553_v54, %v578_v14  ;;  %603 = vadd.xlane.f32.xlu1 %v592_v15  ;;  %605 = vadd.xlane.f32.xlu0 %v593_v16  ;;  %v872_v54 = vld [vmem:[%s1255_s5] ss:$0 sm:$0xff] }
 0x19f   : > { %v571_v18 = vpop.xlane.xlu1 %570 }
 0x1a0   : > { %v580_v19 = vmul.f32 0.0078125, %v571_v18  ;;  %v594_v20 = vmul.f32 %v1202_v17, %v1202_v17 }
 0x1a2   : > { %v1208_v22 = vsub.f32 %v555_v55, %v580_v19  ;;  %607 = vadd.xlane.f32.xlu1 %v594_v20  ;;  %609 = vadd.xlane.f32.xlu0 %v595_v21 }
 0x1a4   : > { %v596_v23 = vmul.f32 %v1208_v22, %v1208_v22 }
 0x1a6   : > { %611 = vadd.xlane.f32.xlu1 %v596_v23 }
 0x21b   : > { %v598_v24 = vpop.xlane.xlu0 %597 }
 0x21c   : > { %v613_v25 = vmul.f32 0.0078125, %v598_v24 }
 0x21e   : > { %v621_v26 = vadd.f32 1e-05, %v613_v25 }
 0x21f   : > { %v600_v27 = vpop.xlane.xlu1 %599 }
 0x220   : > { %989 = vrsqrt.f32 %v621_v26  ;;  %v614_v28 = vmul.f32 0.0078125, %v600_v27 }
 0x222   : > { %v622_v29 = vadd.f32 1e-05, %v614_v28 }
 0x223   : > { %v602_v30 = vpop.xlane.xlu0 %601 }
 0x224   : > { %991 = vrsqrt.f32 %v622_v29  ;;  %v615_v31 = vmul.f32 0.0078125, %v602_v30 }
 0x226   : > { %v623_v32 = vadd.f32 1e-05, %v615_v31 }
 0x227   : > { %v604_v33 = vpop.xlane.xlu1 %603  ;;  %v606_v34 = vpop.xlane.xlu0 %605 }
 0x228   : > { %993 = vrsqrt.f32 %v623_v32  ;;  %v616_v35 = vmul.f32 0.0078125, %v604_v33  ;;  %v617_v36 = vmul.f32 0.0078125, %v606_v34 }
 0x22a   : > { %v624_v37 = vadd.f32 1e-05, %v616_v35  ;;  %v625_v38 = vadd.f32 1e-05, %v617_v36 }
 0x22b   : > { %v608_v39 = vpop.xlane.xlu1 %607  ;;  %v610_v40 = vpop.xlane.xlu0 %609 }
 0x22c   : > { %995 = vrsqrt.f32 %v624_v37  ;;  %v618_v41 = vmul.f32 0.0078125, %v608_v39  ;;  %v619_v42 = vmul.f32 0.0078125, %v610_v40 }
 0x22d   : > { %v990_v43 = vpop.eup %989  ;;  %997 = vrsqrt.f32 %v625_v38 }
 0x22e   : > { %v637_v44 = vmul.f32 %v990_v43, %v1180_v58  ;;  %v626_v45 = vadd.f32 1e-05, %v618_v41  ;;  %v627_v46 = vadd.f32 1e-05, %v619_v42 }
 0x22f   : > { %v612_v48 = vpop.xlane.xlu1 %611 }
 0x230   : > { %999 = vrsqrt.f32 %v626_v45  ;;  %v620_v49 = vmul.f32 0.0078125, %v612_v48  ;;  %v652_v51 = vmul.f32 %v871_v47, %v637_v44 }
 0x231   : > { %v992_v50 = vpop.eup %991  ;;  %1001 = vrsqrt.f32 %v627_v46 }
 0x232   : > { %v638_v52 = vmul.f32 %v992_v50, %v1184_v62  ;;  %v628_v53 = vadd.f32 1e-05, %v620_v49  ;;  %v667_v57 = vadd.f32 %v872_v54, %v652_v51 }
 0x234   : > { %v653_v55 = vmul.f32 %v871_v47, %v638_v52  ;;  %1003 = vrsqrt.f32 %v628_v53 }
 0x235   : > { %v994_v56 = vpop.eup %993 }
 0x236   : > { %v668_v58 = vadd.f32 %v872_v54, %v653_v55  ;;  %v639_v59 = vmul.f32 %v994_v56, %v1188_v4 }
 0x238   : > { %v895_v60 = vpack.c.bf16 %v668_v58, %v667_v57  ;;  %v654_v61 = vmul.f32 %v871_v47, %v639_v59  ;;  %v720_v3 = vadd.f32 %v668_v58, %v667_v57 }
 0x239   : > { %v996_v62 = vpop.eup %995 }
 0x23a   : > { %v998_v63 = vpop.eup %997  ;;  %896 = vst [vmem:[%s1225_s11] sm:$0xff] %v895_v60   ;;  %v669_v0 = vadd.f32 %v872_v54, %v654_v61  ;;  %v640_v1 = vmul.f32 %v996_v62, %v1194_v11 }
 0x23b   : > { %v641_v2 = vmul.f32 %v998_v63, %v1190_v7 }
 0x23c   : > { %v655_v5 = vmul.f32 %v871_v47, %v640_v1  ;;  %v721_v9 = vadd.f32 %v720_v3, %v669_v0 }
 0x23d   : > { %v1000_v4 = vpop.eup %999  ;;  %v656_v6 = vmul.f32 %v871_v47, %v641_v2 }
 0x23e   : > { %v1002_v8 = vpop.eup %1001  ;;  %v670_v10 = vadd.f32 %v872_v54, %v655_v5  ;;  %v642_v12 = vmul.f32 %v1000_v4, %v1202_v17 }
 0x23f   : > { %v643_v14 = vmul.f32 %v1002_v8, %v1196_v13  ;;  %v671_v18 = vadd.f32 %v872_v54, %v656_v6 }
 0x240   : > { %v900_v15 = vpack.c.bf16 %v670_v10, %v669_v0  ;;  %v722_v16 = vadd.f32 %v721_v9, %v670_v10  ;;  %v657_v19 = vmul.f32 %v871_v47, %v642_v12 }
 0x241   : > { %v1004_v11 = vpop.eup %1003  ;;  %v658_v7 = vmul.f32 %v871_v47, %v643_v14 }
 0x242   : > { %912 = vst [vmem:[%s1225_s11 + $0x8] sm:$0xff] %v900_v15   ;;  %v723_v20 = vadd.f32 %v722_v16, %v671_v18  ;;  %v672_v21 = vadd.f32 %v872_v54, %v657_v19  ;;  %v644_v23 = vmul.f32 %v1004_v11, %v1208_v22 }
 0x243   : > { %v673_v17 = vadd.f32 %v872_v54, %v658_v7 }
 0x244   : > { %v905_v24 = vpack.c.bf16 %v672_v21, %v671_v18  ;;  %v724_v25 = vadd.f32 %v723_v20, %v672_v21  ;;  %v659_v26 = vmul.f32 %v871_v47, %v644_v23 }
 0x246   : > { %913 = vst [vmem:[%s1225_s11 + $0x10] sm:$0xff] %v905_v24   ;;  %v725_v13 = vadd.f32 %v724_v25, %v673_v17  ;;  %v674_v27 = vadd.f32 %v872_v54, %v659_v26 }
 0x248   : > { %v910_v28 = vpack.c.bf16 %v674_v27, %v673_v17  ;;  %v726_v29 = vadd.f32 %v725_v13, %v674_v27 }
 0x24a   : > { %914 = vst [vmem:[%s1225_s11 + $0x18] sm:$0xff] %v910_v28   ;;  %v727_v30 = vrot.slane %v726_v29, 4 }
 0x24c   : > { %v728_v31 = vadd.f32 %v727_v30, %v726_v29 }
 0x24e   : > { %v729_v32 = vrot.slane %v728_v31, 2 }
 0x250   : > { %v730_v33 = vadd.f32 %v729_v32, %v728_v31 }
 0x252   : > { %v731_v34 = vrot.slane %v730_v33, 1 }
 0x254   : > { %v732_v35 = vadd.f32 %v731_v34, %v730_v33 }
 0x256   : > { %735 = vst [vmem:[%s319_s14] sm:$0xff] %v732_v35 }
 0x257 PF: > { %s18_s26 = sadd.s32 1, %s1027_s26   ;;  %s1258_s24 = smov %s1023_s25 }
 0x258   : > { %p15_p6 = scmp.ge.s32.totalorder %s18_s26, 4   ;;  %s1259_s25 = smov %s1261_s27 }
 0x25a   :  { %17 = sbr.rel (!%p15_p6) target bundleno = 2 (0x2), region = 90 }

// kernel: squeeze.3
= control target key start
LH: loop header
LB: loop body
LE: loop exit
PB: predicated region body
PF: predicated region fallthrough
CT: control target
= control target key end

     0   :  { %s64_s0 = inlined_call_operand.vmem [shape: f32[8,128], index: 0, kind: input, shape index: {}]   ;;  %s65_s1 = inlined_call_operand.vmem [shape: f32[2,512], index: 1, kind: output, shape index: {}]  }
   0x1   :  { %v2_v0 = vld [vmem:[%s64_s0] sm:$0xff]  }
   0x2   :  { %3 = vst [vmem:[#allocation0] ss:$8 sm:$0xf] %v2_v0   ;;  %5 = vst [vmem:[#allocation0 - $0x1f] ss:$8 sm:$0xf0] %v2_v0  }
   0x9   :  { %v10_v1 = vld [vmem:[#allocation0] sm:$0x3]  ;;  %v15_v2 = vld [vmem:[#allocation0 + $0x8] sm:$0x3]  ;;  %v21_v3 = vld [vmem:[#allocation0 + $0x10] sm:$0x3] }
   0xa   :  { %13 = vst [vmem:[%s65_s1] sm:$0x3] %v10_v1  ;;  %36 = vst [vmem:[%s65_s1 + $0x2] sm:$0x3] %v15_v2  ;;  %v28_v4 = vld [vmem:[#allocation0 + $0x18] sm:$0x3] }
   0xb   :  { %37 = vst [vmem:[%s65_s1 + $0x4] sm:$0x3] %v21_v3  ;;  %38 = vst [vmem:[%s65_s1 + $0x6] sm:$0x3] %v28_v4 }

// kernel: clip_dualist_forward.4
= control target key start
LH: loop header
LB: loop body
LE: loop exit
PB: predicated region body
PF: predicated region fallthrough
CT: control target
= control target key end

     0   :  { %s1315_s24 = smov 0   ;;  %s1666_s0 = inlined_call_operand.vmem [shape: bf16[128,128], index: 0, kind: input, shape index: {}]   ;;  %s1667_s1 = inlined_call_operand.vmem [shape: f32[1,128], index: 1, kind: input, shape index: {}]   ;;  %s1668_s2 = inlined_call_operand.vmem [shape: f32[1,128], index: 2, kind: input, shape index: {}]   ;;  %s1669_s3 = inlined_call_operand.vmem [shape: bf16[128,256], index: 3, kind: input, shape index: {}]   ;;  %s1670_s4 = inlined_call_operand.vmem [shape: f32[1,256], index: 4, kind: input, shape index: {}]   ;;  %s1671_s5 = inlined_call_operand.vmem [shape: bf16[256,128], index: 5, kind: input, shape index: {}]   ;;  %s1672_s6 = inlined_call_operand.vmem [shape: f32[1,128], index: 6, kind: input, shape index: {}]   ;;  %s1673_s7 = inlined_call_operand.vmem [shape: f32[8,8,128], index: 7, kind: output, shape index: {}]  }
   0x1 LB: > { %s1064_s25 = sadd.s32 4294967295, %s1272_s24   ;;  %p1068_p0 = scmp.ge.s32.totalorder %s1272_s24, 1  ;;  %s1272_s24 = sphi %s1315_s24, %s17_s24  }
   0x2   : > { %p238_p1 = scmp.lt.s32.totalorder %s1272_s24, 3 }
   0x4   : > { %p239_p2 = pnand %p1068_p0, %p238_p1 }
   0x5   : > { %s1069_s26 = sshll.u32 (!%p239_p2), %s1064_s25, 3  ;;  %s1071_s17 = sshll.u32 (!%p239_p2), %s1064_s25, 2 }
   0x6   : > { %242 = sbr.rel (%p239_p2) target bundleno = 810 (0x32a), region = 48  ;;  %p271_p3 = scmp.lt.s32.totalorder (!%p239_p2), %s1069_s26, 15 }
   0x7   : > { %p277_p4 = scmp.lt.s32.totalorder (!%p239_p2), %s1071_s17, 7 }
   0xb   : > { %s1675_s26 = smov (!%p271_p3, %s1069_s26), 15  ;;  %v1178_v12 = vld [vmem:[%s1669_s3 + $0x74] ss:$8 sps:$4 sm:$0xff]   ;;  %v1180_v13 = vld [vmem:[%s1669_s3 + $0x70] ss:$8 sps:$4 sm:$0xff]   ;;  %v1274_v59 = vmov 0  }
   0xc   : > { %s1070_s27 = sshll.u32 %s1675_s26, 2  ;;  %530 = vmatprep.subr.bf16.mxu0 %v1178_v12  ;;  %v1181_v45 = vld [vmem:[%s1669_s3 + $0x64] ss:$8 sps:$4 sm:$0xff]   ;;  %v1183_v46 = vld [vmem:[%s1669_s3 + $0x60] ss:$8 sps:$4 sm:$0xff]   ;;  %562 = vmatprep.mubr.bf16.mxu0 %v1274_v59  ;;  %s1677_s17 = smov (!%p277_p4, %s1071_s17), 7 }
   0xd   : > { %s274_s30 = scalar_lea.vmem %s1666_s0, %s1070_s27  ;;  %531 = vmatpush1.bf16.msra.mxu0 %v1180_v13  ;;  %v1184_v48 = vld [vmem:[%s1669_s3 + $0x54] ss:$8 sps:$4 sm:$0xff]   ;;  %v1186_v49 = vld [vmem:[%s1669_s3 + $0x50] ss:$8 sps:$4 sm:$0xff]   ;;  %v1187_v50 = vld [vmem:[%s1669_s3 + $0x44] ss:$8 sps:$4 sm:$0xff]  }
   0xe   : > { %v1111_v0 = vld [vmem:[%s274_s30] sm:$0xff]   ;;  %v1126_v1 = vld [vmem:[%s274_s30 + $0x8] sm:$0xff]   ;;  %v1127_v4 = vld [vmem:[%s274_s30 + $0x10] sm:$0xff]   ;;  %532 = vmatprep.subr.bf16.mxu0 %v1181_v45  ;;  %s1072_s25 = sshll.u32 %s1677_s17, 3 }
   0xf   : > { %v1328_v2 = vunpack.c.l.bf16 %v1111_v0  ;;  %v1330_v3 = vunpack.c.l.bf16 %v1126_v1  ;;  %v1334_v5 = vunpack.c.h.bf16 %v1111_v0  ;;  %v1336_v6 = vunpack.c.h.bf16 %v1126_v1  ;;  %v1128_v7 = vld [vmem:[%s274_s30 + $0x18] sm:$0xff]   ;;  %v1189_v51 = vld [vmem:[%s1669_s3 + $0x40] ss:$8 sps:$4 sm:$0xff]   ;;  %v1193_v54 = vld [vmem:[%s1669_s3 + $0x24] ss:$8 sps:$4 sm:$0xff]   ;;  %s1655_s20 = scalar_lea.vmem %s1673_s7, %s1072_s25 }
  0x10   : > { %v1340_v8 = vunpack.c.l.bf16 %v1127_v4  ;;  %v1342_v9 = vunpack.c.h.bf16 %v1127_v4  ;;  %v1346_v10 = vunpack.c.l.bf16 %v1128_v7  ;;  %v1348_v11 = vunpack.c.h.bf16 %v1128_v7  ;;  %v1190_v52 = vld [vmem:[%s1669_s3 + $0x34] ss:$8 sps:$4 sm:$0xff]   ;;  %v1192_v53 = vld [vmem:[%s1669_s3 + $0x30] ss:$8 sps:$4 sm:$0xff]   ;;  %v1195_v55 = vld [vmem:[%s1669_s3 + $0x20] ss:$8 sps:$4 sm:$0xff]  }
  0x11   : > { %299 = vadd.xlane.f32.xlu0 %v1328_v2  ;;  %303 = vadd.xlane.f32.xlu1 %v1330_v3  ;;  %v1196_v56 = vld [vmem:[%s1669_s3 + $0x14] ss:$8 sps:$4 sm:$0xff]   ;;  %v1198_v57 = vld [vmem:[%s1669_s3 + $0x10] ss:$8 sps:$4 sm:$0xff]   ;;  %v1199_v58 = vld [vmem:[%s1669_s3 + $0x4] ss:$8 sps:$4 sm:$0xff]  }
  0x12   : > { %533 = vmatpush1.bf16.msra.mxu0 %v1183_v46  ;;  %v1201_v60 = vld [vmem:[%s1669_s3] ss:$8 sps:$4 sm:$0xff]  }
  0x13   : > { %534 = vmatprep.subr.bf16.mxu0 %v1184_v48 }
  0x15   : > { %301 = vadd.xlane.f32.xlu0 %v1334_v5  ;;  %305 = vadd.xlane.f32.xlu1 %v1336_v6 }
  0x16   : > { %535 = vmatpush1.bf16.msra.mxu0 %v1186_v49 }
  0x17   : > { %536 = vmatprep.subr.bf16.mxu0 %v1187_v50 }
  0x19   : > { %307 = vadd.xlane.f32.xlu0 %v1340_v8  ;;  %309 = vadd.xlane.f32.xlu1 %v1342_v9 }
  0x1a   : > { %537 = vmatpush1.bf16.msra.mxu0 %v1189_v51 }
  0x1b   : > { %538 = vmatprep.subr.bf16.mxu0 %v1190_v52 }
  0x1d   : > { %311 = vadd.xlane.f32.xlu0 %v1346_v10  ;;  %313 = vadd.xlane.f32.xlu1 %v1348_v11 }
  0x1e   : > { %539 = vmatpush1.bf16.msra.mxu0 %v1192_v53 }
  0x1f   : > { %540 = vmatprep.subr.bf16.mxu0 %v1193_v54 }
  0x22   : > { %541 = vmatpush1.bf16.msra.mxu0 %v1195_v55 }
  0x23   : > { %542 = vmatprep.subr.bf16.mxu0 %v1196_v56 }
  0x26   : > { %543 = vmatpush1.bf16.msra.mxu0 %v1198_v57 }
  0x27   : > { %544 = vmatprep.subr.bf16.mxu0 %v1199_v58 }
  0x2a   : > { %545 = vmatpush1.bf16.msra.mxu0 %v1201_v60 }
  0x9a   : > { %v300_v14 = vpop.xlane.xlu0 %299  ;;  %v304_v15 = vpop.xlane.xlu1 %303 }
  0x9b   : > { %v316_v16 = vmul.f32 0.0078125, %v300_v14  ;;  %v318_v17 = vmul.f32 0.0078125, %v304_v15 }
  0x9d   : > { %v1359_v18 = vsub.f32 %v1328_v2, %v316_v16  ;;  %v1362_v19 = vsub.f32 %v1330_v3, %v318_v17 }
  0x9e   : > { %v302_v20 = vpop.xlane.xlu0 %301  ;;  %v306_v21 = vpop.xlane.xlu1 %305 }
  0x9f   : > { %v317_v22 = vmul.f32 0.0078125, %v302_v20  ;;  %v332_v23 = vmul.f32 %v1359_v18, %v1359_v18  ;;  %v319_v24 = vmul.f32 0.0078125, %v306_v21  ;;  %v334_v27 = vmul.f32 %v1362_v19, %v1362_v19 }
  0xa1   : > { %v1367_v25 = vsub.f32 %v1334_v5, %v317_v22  ;;  %340 = vadd.xlane.f32.xlu0 %v332_v23  ;;  %v1370_v26 = vsub.f32 %v1336_v6, %v319_v24 }
  0xa2   : > { %v308_v28 = vpop.xlane.xlu0 %307  ;;  %v310_v29 = vpop.xlane.xlu1 %309 }
  0xa3   : > { %v320_v30 = vmul.f32 0.0078125, %v308_v28  ;;  %v333_v31 = vmul.f32 %v1367_v25, %v1367_v25  ;;  %v321_v32 = vmul.f32 0.0078125, %v310_v29  ;;  %v335_v35 = vmul.f32 %v1370_v26, %v1370_v26 }
  0xa5   : > { %v1377_v33 = vsub.f32 %v1340_v8, %v320_v30  ;;  %344 = vadd.xlane.f32.xlu0 %v334_v27  ;;  %342 = vadd.xlane.f32.xlu1 %v333_v31  ;;  %v1380_v34 = vsub.f32 %v1342_v9, %v321_v32 }
  0xa6   : > { %v312_v36 = vpop.xlane.xlu0 %311  ;;  %v314_v37 = vpop.xlane.xlu1 %313 }
  0xa7   : > { %v322_v38 = vmul.f32 0.0078125, %v312_v36  ;;  %v336_v39 = vmul.f32 %v1377_v33, %v1377_v33  ;;  %v323_v40 = vmul.f32 0.0078125, %v314_v37  ;;  %v337_v43 = vmul.f32 %v1380_v34, %v1380_v34 }
  0xa9   : > { %v1387_v41 = vsub.f32 %v1346_v10, %v322_v38  ;;  %346 = vadd.xlane.f32.xlu1 %v335_v35  ;;  %348 = vadd.xlane.f32.xlu0 %v336_v39  ;;  %v1390_v42 = vsub.f32 %v1348_v11, %v323_v40  ;;  %v1073_v35 = vld [vmem:[%s1667_s1] ss:$0 sm:$0xff] }
  0xab   : > { %v338_v44 = vmul.f32 %v1387_v41, %v1387_v41  ;;  %v339_v47 = vmul.f32 %v1390_v42, %v1390_v42 }
  0xad   : > { %350 = vadd.xlane.f32.xlu1 %v337_v43  ;;  %352 = vadd.xlane.f32.xlu0 %v338_v44  ;;  %v1074_v44 = vld [vmem:[%s1668_s2] ss:$0 sm:$0xff] }
  0xb1   : > { %354 = vadd.xlane.f32.xlu1 %v339_v47 }
 0x12a   : > { %v341_v61 = vpop.xlane.xlu0 %340 }
 0x12b   : > { %v356_v62 = vmul.f32 0.0078125, %v341_v61 }
 0x12d   : > { %v364_v63 = vadd.f32 1e-05, %v356_v62 }
 0x12e   : > { %v343_v0 = vpop.xlane.xlu1 %342  ;;  %v345_v1 = vpop.xlane.xlu0 %344 }
 0x12f   : > { %1218 = vrsqrt.f32 %v364_v63  ;;  %v357_v4 = vmul.f32 0.0078125, %v343_v0  ;;  %v358_v7 = vmul.f32 0.0078125, %v345_v1 }
 0x131   : > { %v365_v12 = vadd.f32 1e-05, %v357_v4  ;;  %v366_v13 = vadd.f32 1e-05, %v358_v7 }
 0x132   : > { %v347_v14 = vpop.xlane.xlu1 %346  ;;  %v349_v15 = vpop.xlane.xlu0 %348 }
 0x133   : > { %1220 = vrsqrt.f32 %v365_v12  ;;  %v359_v16 = vmul.f32 0.0078125, %v347_v14  ;;  %v360_v20 = vmul.f32 0.0078125, %v349_v15  ;;  %v1202_v14 = vld [vmem:[%s1671_s5 + $0x78] sm:$0xff]   ;;  %v1206_v15 = vld [vmem:[%s1671_s5 + $0x68] sm:$0xff]  }
 0x134   : > { %1222 = vrsqrt.f32 %v366_v13  ;;  %1129 = vmatprep.subr.bf16.mxu1 %v1202_v14 }
 0x135   : > { %v367_v17 = vadd.f32 1e-05, %v359_v16  ;;  %v368_v23 = vadd.f32 1e-05, %v360_v20  ;;  %v1207_v16 = vld [vmem:[%s1671_s5 + $0x28] sm:$0xff]   ;;  %v1209_v20 = vld [vmem:[%s1671_s5 + $0x20] sm:$0xff]  }
 0x136   : > { %v351_v21 = vpop.xlane.xlu1 %350  ;;  %v353_v27 = vpop.xlane.xlu0 %352 }
 0x137   : > { %1224 = vrsqrt.f32 %v367_v17  ;;  %v361_v22 = vmul.f32 0.0078125, %v351_v21  ;;  %v362_v31 = vmul.f32 0.0078125, %v353_v27  ;;  %v1208_v17 = vld [vmem:[%s1671_s5 + $0x60] sm:$0xff]   ;;  %v1210_v21 = vld [vmem:[%s1671_s5 + $0x58] sm:$0xff]   ;;  %v1214_v27 = vld [vmem:[%s1671_s5 + $0x48] sm:$0xff]  }
 0x139   : > { %v369_v24 = vadd.f32 1e-05, %v361_v22  ;;  %v370_v38 = vadd.f32 1e-05, %v362_v31  ;;  %v1211_v22 = vld [vmem:[%s1671_s5 + $0x18] sm:$0xff]   ;;  %v440_v31 = vlaneseq }
 0x13a   : > { %v355_v28 = vpop.xlane.xlu1 %354 }
 0x13b   : > { %1226 = vrsqrt.f32 %v369_v24  ;;  %v363_v29 = vmul.f32 0.0078125, %v355_v28  ;;  %v1213_v24 = vld [vmem:[%s1671_s5 + $0x10] sm:$0xff]   ;;  %v1215_v28 = vld [vmem:[%s1671_s5 + $0x8] sm:$0xff]  }
 0x13c   : > { %v1219_v30 = vpop.eup %1218  ;;  %1228 = vrsqrt.f32 %v368_v23  ;;  %v1212_v23 = vld [vmem:[%s1671_s5 + $0x50] sm:$0xff]  }
 0x13d   : > { %v380_v32 = vmul.f32 %v1219_v30, %v1359_v18  ;;  %v371_v36 = vadd.f32 1e-05, %v363_v29  ;;  %v1216_v29 = vld [vmem:[%s1671_s5 + $0x40] sm:$0xff]  }
 0x13e   : > { %v1217_v30 = vld [vmem:[%s1671_s5] sm:$0xff]  }
 0x13f   : > { %v395_v40 = vmul.f32 %v1073_v35, %v380_v32  ;;  %1230 = vrsqrt.f32 %v371_v36  ;;  %v441_v32 = vshrl.u32 %v440_v31, 7  ;;  %v438_v36 = vld [vmem:[%s1670_s4] sm:$0x3] }
 0x140   : > { %v1221_v37 = vpop.eup %1220  ;;  %1232 = vrsqrt.f32 %v370_v38 }
 0x141   : > { %v381_v39 = vmul.f32 %v1221_v37, %v1367_v25  ;;  %v1223_v43 = vpop.eup %1222  ;;  %v410_v18 = vadd.f32 %v1074_v44, %v395_v40  ;;  %v446_v37 = vsub.s32 1, %v441_v32 }
 0x142   : > { %v382_v48 = vmul.f32 %v1223_v43, %v1362_v19 }
 0x143   : > { %v396_v45 = vmul.f32 %v1073_v35, %v381_v39  ;;  %v1511_v39 = vrot.slane %v438_v36, %v446_v37 }
 0x144   : > { %v1225_v46 = vpop.eup %1224  ;;  %v397_v25 = vmul.f32 %v1073_v35, %v382_v48 }
 0x145   : > { %v411_v47 = vadd.f32 %v1074_v44, %v396_v45  ;;  %v383_v49 = vmul.f32 %v1225_v46, %v1370_v26 }
 0x146   : > { %v412_v56 = vadd.f32 %v1074_v44, %v397_v25 }
 0x147   : > { %v418_v50 = vpack.c.bf16 %v411_v47, %v410_v18  ;;  %v398_v51 = vmul.f32 %v1073_v35, %v383_v49 }
 0x148   : > { %v1227_v52 = vpop.eup %1226 }
 0x149   : > { %563 = vmatmul.mubr.bf16.vlgmr.msra.gmra.mxu0 %v418_v50  ;;  %v1229_v53 = vpop.eup %1228  ;;  %v413_v54 = vadd.f32 %v1074_v44, %v398_v51  ;;  %v385_v55 = vmul.f32 %v1227_v52, %v1380_v34 }
 0x14a   : > { %572 = vmatprep.mubr.bf16.mxu0 %v1274_v59  ;;  %v384_v57 = vmul.f32 %v1229_v53, %v1377_v33 }
 0x14b   : > { %v419_v58 = vpack.c.bf16 %v413_v54, %v412_v56  ;;  %v400_v60 = vmul.f32 %v1073_v35, %v385_v55 }
 0x14c   : > { %v1231_v61 = vpop.eup %1230  ;;  %v399_v26 = vmul.f32 %v1073_v35, %v384_v57 }
 0x14d   : > { %v1233_v19 = vpop.eup %1232  ;;  %v415_v62 = vadd.f32 %v1074_v44, %v400_v60  ;;  %v387_v63 = vmul.f32 %v1231_v61, %v1390_v42  ;;  %v1203_v42 = vld [vmem:[%s1671_s5 + $0x38] sm:$0xff]  }
 0x14e   : > { %v414_v0 = vadd.f32 %v1074_v44, %v399_v26  ;;  %v386_v1 = vmul.f32 %v1233_v19, %v1387_v41  ;;  %1130 = vmatpush3.bf16.msra.mxu1 %v1203_v42  ;;  %v1204_v41 = vld [vmem:[%s1671_s5 + $0x70] sm:$0xff]  }
 0x14f   : > { %v402_v7 = vmul.f32 %v1073_v35, %v387_v63  ;;  %1131 = vmatprep.subr.bf16.mxu1 %v1204_v41 }
 0x150   : > { %v420_v4 = vpack.c.bf16 %v415_v62, %v414_v0  ;;  %v401_v34 = vmul.f32 %v1073_v35, %v386_v1  ;;  %v442_v35 = vsub.s32 0, %v441_v32 }
 0x151   : > { %573 = vmatmul.mubr.bf16.gmra.mxu0 %v419_v58  ;;  %v417_v33 = vadd.f32 %v1074_v44, %v402_v7 }
 0x152   : > { %582 = vmatprep.mubr.bf16.mxu0 %v1274_v59  ;;  %v416_v12 = vadd.f32 %v1074_v44, %v401_v34  ;;  %v1509_v38 = vrot.slane %v438_v36, %v442_v35 }
 0x154   : > { %v421_v13 = vpack.c.bf16 %v417_v33, %v416_v12 }
 0x159   : > { %583 = vmatmul.mubr.bf16.gmra.mxu0 %v420_v4 }
 0x15a   : > { %592 = vmatprep.mubr.bf16.mxu0 %v1274_v59  ;;  %v1205_v59 = vld [vmem:[%s1671_s5 + $0x30] sm:$0xff]  }
 0x15b   : > { %1132 = vmatpush3.bf16.msra.mxu1 %v1205_v59 }
 0x15c   : > { %1133 = vmatprep.subr.bf16.mxu1 %v1206_v15 }
 0x15f   : > { %1134 = vmatpush3.bf16.msra.mxu1 %v1207_v16 }
 0x160   : > { %1135 = vmatprep.subr.bf16.mxu1 %v1208_v17 }
 0x161   : > { %593 = vmatmul.mubr.bf16.gmra.mxu0 %v421_v13 }
 0x163   : > { %1136 = vmatpush3.bf16.msra.mxu1 %v1209_v20 }
 0x164   : > { %1137 = vmatprep.subr.bf16.mxu1 %v1210_v21 }
 0x167   : > { %1138 = vmatpush3.bf16.msra.mxu1 %v1211_v22 }
 0x168   : > { %1139 = vmatprep.subr.bf16.mxu1 %v1212_v23 }
 0x16b   : > { %1140 = vmatpush3.bf16.msra.mxu1 %v1213_v24 }
 0x16c   : > { %1141 = vmatprep.subr.bf16.mxu1 %v1214_v27 }
 0x16f   : > { %1142 = vmatpush3.bf16.msra.mxu1 %v1215_v28 }
 0x170   : > { %1143 = vmatprep.subr.bf16.mxu1 %v1216_v29 }
 0x173   : > { %1144 = vmatpush3.bf16.msra.mxu1 %v1217_v30 }
 0x209   : > { %v564_v40 = vpop.f32.mrf.mxu0 }
 0x20a   : > { %v1514_v43 = vadd.f32 %v564_v40, %v1509_v38 }
 0x20b   : > { %v566_v44 = vpop.f32.mrf.mxu0 }
 0x20c   : > { %v603_v45 = vmul.f32 %v1514_v43, %v1514_v43  ;;  %v1519_v46 = vadd.f32 %v566_v44, %v1511_v39 }
 0x20d   : > { %v568_v18 = vpop.f32.mrf.mxu0 }
 0x20e   : > { %v619_v47 = vmul.f32 %v603_v45, %v1514_v43  ;;  %v604_v48 = vmul.f32 %v1519_v46, %v1519_v46  ;;  %v1525_v49 = vadd.f32 %v568_v18, %v1509_v38 }
 0x20f   : > { %v570_v50 = vpop.f32.mrf.mxu0 }
 0x210   : > { %v635_v51 = vmul.f32 0.044715, %v619_v47  ;;  %v620_v52 = vmul.f32 %v604_v48, %v1519_v46  ;;  %v605_v25 = vmul.f32 %v1525_v49, %v1525_v49  ;;  %v1531_v53 = vadd.f32 %v570_v50, %v1511_v39 }
 0x211   : > { %v574_v54 = vpop.f32.mrf.mxu0 }
 0x212   : > { %v651_v55 = vadd.f32 %v635_v51, %v1514_v43  ;;  %v636_v56 = vmul.f32 0.044715, %v620_v52  ;;  %v621_v57 = vmul.f32 %v605_v25, %v1525_v49  ;;  %v606_v58 = vmul.f32 %v1531_v53, %v1531_v53 }
 0x213   : > { %v1538_v60 = vadd.f32 %v574_v54, %v1509_v38  ;;  %v576_v61 = vpop.f32.mrf.mxu0 }
 0x214   : > { %v667_v19 = vmul.f32 0.7978846, %v651_v55  ;;  %v652_v26 = vadd.f32 %v636_v56, %v1519_v46  ;;  %v637_v62 = vmul.f32 0.044715, %v621_v57  ;;  %v622_v63 = vmul.f32 %v606_v58, %v1531_v53 }
 0x215   : > { %v607_v0 = vmul.f32 %v1538_v60, %v1538_v60  ;;  %v1545_v1 = vadd.f32 %v576_v61, %v1511_v39  ;;  %v578_v4 = vpop.f32.mrf.mxu0 }
 0x216   : > { %1234 = vtanh.f32 %v667_v19  ;;  %v653_v7 = vadd.f32 %v637_v62, %v1525_v49  ;;  %v638_v34 = vmul.f32 0.044715, %v622_v63  ;;  %v1549_v33 = vadd.f32 %v578_v4, %v1509_v38 }
 0x217   : > { %v623_v12 = vmul.f32 %v607_v0, %v1538_v60  ;;  %v608_v13 = vmul.f32 %v1545_v1, %v1545_v1  ;;  %v580_v14 = vpop.f32.mrf.mxu0  ;;  %v668_v42 = vmul.f32 0.7978846, %v652_v26 }
 0x218   : > { %v669_v41 = vmul.f32 0.7978846, %v653_v7  ;;  %v654_v59 = vadd.f32 %v638_v34, %v1531_v53  ;;  %v609_v15 = vmul.f32 %v1549_v33, %v1549_v33  ;;  %v1558_v16 = vadd.f32 %v580_v14, %v1511_v39 }
 0x219   : > { %v639_v17 = vmul.f32 0.044715, %v623_v12  ;;  %v624_v20 = vmul.f32 %v608_v13, %v1545_v1  ;;  %v584_v21 = vpop.f32.mrf.mxu0  ;;  %1236 = vtanh.f32 %v668_v42 }
 0x21a   : > { %1238 = vtanh.f32 %v669_v41  ;;  %v625_v22 = vmul.f32 %v609_v15, %v1549_v33  ;;  %v610_v23 = vmul.f32 %v1558_v16, %v1558_v16  ;;  %v1565_v24 = vadd.f32 %v584_v21, %v1509_v38 }
 0x21b   : > { %v655_v27 = vadd.f32 %v639_v17, %v1538_v60  ;;  %v640_v28 = vmul.f32 0.044715, %v624_v20  ;;  %v586_v29 = vpop.f32.mrf.mxu0  ;;  %v670_v30 = vmul.f32 0.7978846, %v654_v59 }
 0x21c   : > { %v641_v31 = vmul.f32 0.044715, %v625_v22  ;;  %v626_v32 = vmul.f32 %v610_v23, %v1558_v16  ;;  %v611_v35 = vmul.f32 %v1565_v24, %v1565_v24  ;;  %v1572_v36 = vadd.f32 %v586_v29, %v1511_v39 }
 0x21d   : > { %v671_v37 = vmul.f32 0.7978846, %v655_v27  ;;  %v656_v40 = vadd.f32 %v640_v28, %v1545_v1  ;;  %v588_v44 = vpop.f32.mrf.mxu0  ;;  %1240 = vtanh.f32 %v670_v30 }
 0x21e   : > { %v657_v45 = vadd.f32 %v641_v31, %v1549_v33  ;;  %v642_v18 = vmul.f32 0.044715, %v626_v32  ;;  %v627_v47 = vmul.f32 %v611_v35, %v1565_v24  ;;  %v612_v48 = vmul.f32 %v1572_v36, %v1572_v36 }
 0x21f   : > { %1242 = vtanh.f32 %v671_v37  ;;  %v672_v50 = vmul.f32 0.7978846, %v656_v40  ;;  %v1580_v51 = vadd.f32 %v588_v44, %v1509_v38  ;;  %v590_v52 = vpop.f32.mrf.mxu0 }
 0x220   : > { %v673_v25 = vmul.f32 0.7978846, %v657_v45  ;;  %v658_v54 = vadd.f32 %v642_v18, %v1558_v16  ;;  %v643_v55 = vmul.f32 0.044715, %v627_v47  ;;  %v628_v56 = vmul.f32 %v612_v48, %v1572_v36 }
 0x221   : > { %1244 = vtanh.f32 %v672_v50  ;;  %v613_v57 = vmul.f32 %v1580_v51, %v1580_v51  ;;  %v1587_v58 = vadd.f32 %v590_v52, %v1511_v39  ;;  %v594_v61 = vpop.f32.mrf.mxu0 }
 0x222   : > { %1246 = vtanh.f32 %v673_v25  ;;  %v674_v19 = vmul.f32 0.7978846, %v658_v54  ;;  %v659_v26 = vadd.f32 %v643_v55, %v1565_v24  ;;  %v644_v62 = vmul.f32 0.044715, %v628_v56 }
 0x223   : > { %v1235_v63 = vpop.eup %1234  ;;  %v629_v0 = vmul.f32 %v613_v57, %v1580_v51  ;;  %v614_v4 = vmul.f32 %v1587_v58, %v1587_v58  ;;  %v1594_v7 = vadd.f32 %v594_v61, %v1509_v38  ;;  %v596_v34 = vpop.f32.mrf.mxu0 }
 0x224   : > { %1248 = vtanh.f32 %v674_v19  ;;  %v675_v12 = vmul.f32 0.7978846, %v659_v26  ;;  %v660_v13 = vadd.f32 %v644_v62, %v1572_v36  ;;  %v1598_v14 = vadd.f32 %v596_v34, %v1511_v39 }
 0x225   : > { %v645_v42 = vmul.f32 0.044715, %v629_v0  ;;  %v630_v41 = vmul.f32 %v614_v4, %v1587_v58  ;;  %v615_v59 = vmul.f32 %v1594_v7, %v1594_v7  ;;  %v598_v15 = vpop.f32.mrf.mxu0  ;;  %v699_v17 = vadd.f32 1.0, %v1235_v63 }
 0x226   : > { %v1237_v20 = vpop.eup %1236  ;;  %1250 = vtanh.f32 %v675_v12  ;;  %v676_v21 = vmul.f32 0.7978846, %v660_v13  ;;  %v616_v22 = vmul.f32 %v1598_v14, %v1598_v14  ;;  %v1606_v23 = vadd.f32 %v598_v15, %v1509_v38 }
 0x227   : > { %v1239_v27 = vpop.eup %1238  ;;  %v661_v28 = vadd.f32 %v645_v42, %v1580_v51  ;;  %v646_v29 = vmul.f32 0.044715, %v630_v41  ;;  %v631_v30 = vmul.f32 %v615_v59, %v1594_v7  ;;  %v600_v31 = vpop.f32.mrf.mxu0  ;;  %v700_v32 = vadd.f32 1.0, %v1237_v20 }
 0x228   : > { %1252 = vtanh.f32 %v676_v21  ;;  %v632_v35 = vmul.f32 %v616_v22, %v1598_v14  ;;  %v617_v37 = vmul.f32 %v1606_v23, %v1606_v23  ;;  %v1614_v40 = vadd.f32 %v600_v31, %v1511_v39 }
 0x229   : > { %v677_v44 = vmul.f32 0.7978846, %v661_v28  ;;  %v662_v38 = vadd.f32 %v646_v29, %v1587_v58  ;;  %v647_v45 = vmul.f32 0.044715, %v631_v30  ;;  %v716_v18 = vmul.f32 0.5, %v700_v32 }
 0x22a   : > { %v1241_v47 = vpop.eup %1240  ;;  %v648_v48 = vmul.f32 0.044715, %v632_v35  ;;  %v633_v50 = vmul.f32 %v617_v37, %v1606_v23  ;;  %v618_v52 = vmul.f32 %v1614_v40, %v1614_v40  ;;  %v701_v25 = vadd.f32 1.0, %v1239_v27 }
 0x22b   : > { %1254 = vtanh.f32 %v677_v44  ;;  %v678_v54 = vmul.f32 0.7978846, %v662_v38  ;;  %v663_v55 = vadd.f32 %v647_v45, %v1594_v7  ;;  %v702_v56 = vadd.f32 1.0, %v1241_v47 }
 0x22c   : > { %v1243_v39 = vpop.eup %1242  ;;  %v664_v57 = vadd.f32 %v648_v48, %v1598_v14  ;;  %v649_v61 = vmul.f32 0.044715, %v633_v50  ;;  %v634_v19 = vmul.f32 %v618_v52, %v1614_v40  ;;  %v732_v26 = vmul.f32 %v716_v18, %v1519_v46 }
 0x22d   : > { %1256 = vtanh.f32 %v678_v54  ;;  %v679_v62 = vmul.f32 0.7978846, %v663_v55  ;;  %v718_v63 = vmul.f32 0.5, %v702_v56  ;;  %v715_v0 = vmul.f32 0.5, %v699_v17 }
 0x22e   : > { %v1245_v4 = vpop.eup %1244  ;;  %v680_v34 = vmul.f32 0.7978846, %v664_v57  ;;  %v665_v12 = vadd.f32 %v649_v61, %v1606_v23  ;;  %v650_v13 = vmul.f32 0.044715, %v634_v19  ;;  %v717_v42 = vmul.f32 0.5, %v701_v25 }
 0x22f   : > { %v1247_v41 = vpop.eup %1246  ;;  %1258 = vtanh.f32 %v679_v62  ;;  %v734_v59 = vmul.f32 %v718_v63, %v1531_v53  ;;  %v731_v15 = vmul.f32 %v715_v0, %v1514_v43  ;;  %v704_v20 = vadd.f32 1.0, %v1245_v4 }
 0x230   : > { %1260 = vtanh.f32 %v680_v34  ;;  %v681_v21 = vmul.f32 0.7978846, %v665_v12  ;;  %v666_v46 = vadd.f32 %v650_v13, %v1614_v40  ;;  %v733_v22 = vmul.f32 %v717_v42, %v1525_v49 }
 0x231   : > { %v1249_v17 = vpop.eup %1248  ;;  %v748_v27 = vpack.c.bf16 %v734_v59, %v732_v26  ;;  %v720_v28 = vmul.f32 0.5, %v704_v20  ;;  %v703_v29 = vadd.f32 1.0, %v1243_v39  ;;  %v705_v30 = vadd.f32 1.0, %v1247_v41 }
 0x232   : > { %1262 = vtanh.f32 %v681_v21  ;;  %v682_v31 = vmul.f32 0.7978846, %v666_v46  ;;  %v747_v32 = vpack.c.bf16 %v733_v22, %v731_v15  ;;  %v706_v35 = vadd.f32 1.0, %v1249_v17 }
 0x233   : > { %v1251_v37 = vpop.eup %1250  ;;  %915 = vmatprep.mubr.bf16.mxu1 %v748_v27  ;;  %v721_v53 = vmul.f32 0.5, %v705_v30  ;;  %v719_v44 = vmul.f32 0.5, %v703_v29  ;;  %v736_v45 = vmul.f32 %v720_v28, %v1545_v1 }
 0x234   : > { %1264 = vtanh.f32 %v682_v31  ;;  %916 = vmatmul.mubr.bf16.vlgmr.msra.gmra.mxu1 %v747_v32  ;;  %v722_v43 = vmul.f32 0.5, %v706_v35  ;;  %v707_v25 = vadd.f32 1.0, %v1251_v37 }
 0x235   : > { %v1253_v38 = vpop.eup %1252  ;;  %v737_v18 = vmul.f32 %v721_v53, %v1549_v33  ;;  %v735_v52 = vmul.f32 %v719_v44, %v1538_v60 }
 0x236   : > { %v738_v49 = vmul.f32 %v722_v43, %v1558_v16  ;;  %v708_v47 = vadd.f32 1.0, %v1253_v38  ;;  %v723_v1 = vmul.f32 0.5, %v707_v25 }
 0x237   : > { %v749_v56 = vpack.c.bf16 %v737_v18, %v735_v52 }
 0x238   : > { %v1255_v48 = vpop.eup %1254  ;;  %v750_v50 = vpack.c.bf16 %v738_v49, %v736_v45  ;;  %v724_v57 = vmul.f32 0.5, %v708_v47  ;;  %v739_v4 = vmul.f32 %v723_v1, %v1565_v24 }
 0x239   : > { %v709_v54 = vadd.f32 1.0, %v1255_v48 }
 0x23a   : > { %v1257_v55 = vpop.eup %1256  ;;  %923 = vmatprep.mubr.bf16.mxu1 %v750_v50  ;;  %v740_v0 = vmul.f32 %v724_v57, %v1572_v36 }
 0x23b   : > { %v710_v39 = vadd.f32 1.0, %v1257_v55  ;;  %v725_v61 = vmul.f32 0.5, %v709_v54 }
 0x23c   : > { %v1259_v19 = vpop.eup %1258  ;;  %924 = vmatmul.mubr.bf16.gmra.mxu1 %v749_v56 }
 0x23d   : > { %v1261_v26 = vpop.eup %1260  ;;  %v726_v16 = vmul.f32 0.5, %v710_v39  ;;  %v741_v33 = vmul.f32 %v725_v61, %v1580_v51  ;;  %v711_v34 = vadd.f32 1.0, %v1259_v19 }
 0x23e   : > { %v712_v62 = vadd.f32 1.0, %v1261_v26 }
 0x23f   : > { %v1263_v63 = vpop.eup %1262  ;;  %v742_v60 = vmul.f32 %v726_v16, %v1587_v58  ;;  %v751_v41 = vpack.c.bf16 %v741_v33, %v739_v4  ;;  %v727_v51 = vmul.f32 0.5, %v711_v34 }
 0x240   : > { %v713_v12 = vadd.f32 1.0, %v1263_v63  ;;  %v728_v15 = vmul.f32 0.5, %v712_v62 }
 0x241   : > { %v1265_v13 = vpop.eup %1264  ;;  %v752_v42 = vpack.c.bf16 %v742_v60, %v740_v0  ;;  %v743_v24 = vmul.f32 %v727_v51, %v1594_v7 }
 0x242   : > { %v714_v59 = vadd.f32 1.0, %v1265_v13  ;;  %v729_v20 = vmul.f32 0.5, %v713_v12  ;;  %v744_v46 = vmul.f32 %v728_v15, %v1598_v14  ;;  %v1107_v14 = vld [vmem:[%s1672_s6] ss:$0 sm:$0xff] }
 0x243   : > { %931 = vmatprep.mubr.bf16.mxu1 %v752_v42 }
 0x244   : > { %932 = vmatmul.mubr.bf16.gmra.mxu1 %v751_v41  ;;  %v730_v21 = vmul.f32 0.5, %v714_v59  ;;  %v745_v58 = vmul.f32 %v729_v20, %v1606_v23 }
 0x246   : > { %v746_v36 = vmul.f32 %v730_v21, %v1614_v40  ;;  %v753_v17 = vpack.c.bf16 %v745_v58, %v743_v24 }
 0x248   : > { %v754_v22 = vpack.c.bf16 %v746_v36, %v744_v46 }
 0x24a   : > { %939 = vmatprep.mubr.bf16.mxu1 %v754_v22 }
 0x24c   : > { %940 = vmatmul.mubr.bf16.gmra.mxu1 %v753_v17 }
 0x2f4   : > { %v1145_v27 = vpop.f32.mrf.mxu1 }
 0x2f6   : > { %v1146_v28 = vpop.f32.mrf.mxu1 }
 0x2f7   : > { %v1147_v29 = vadd.f32 %v1146_v28, %v1145_v27 }
 0x2f8   : > { %v1148_v30 = vpop.f32.mrf.mxu1 }
 0x2f9   : > { %v948_v32 = vadd.f32 %v1147_v29, %v1328_v2 }
 0x2fa   : > { %v1149_v31 = vpop.f32.mrf.mxu1 }
 0x2fb   : > { %v1150_v35 = vadd.f32 %v1149_v31, %v1148_v30  ;;  %v963_v37 = vadd.f32 %v1107_v14, %v948_v32 }
 0x2fc   : > { %v1151_v23 = vpop.f32.mrf.mxu1 }
 0x2fd   : > { %v949_v40 = vadd.f32 %v1150_v35, %v1334_v5 }
 0x2fe   : > { %v1152_v7 = vpop.f32.mrf.mxu1 }
 0x2ff   : > { %v964_v53 = vadd.f32 %v1107_v14, %v949_v40  ;;  %v1153_v43 = vadd.f32 %v1152_v7, %v1151_v23 }
 0x300   : > { %v1154_v44 = vpop.f32.mrf.mxu1 }
 0x301   : > { %v971_v38 = vadd.f32 %v964_v53, %v963_v37  ;;  %v950_v2 = vadd.f32 %v1153_v43, %v1330_v3 }
 0x302   : > { %v1155_v45 = vpop.f32.mrf.mxu1 }
 0x303   : > { %v972_v49 = vrot.slane %v971_v38, 4  ;;  %v1156_v18 = vadd.f32 %v1155_v45, %v1154_v44  ;;  %v965_v25 = vadd.f32 %v1107_v14, %v950_v2 }
 0x304   : > { %v1157_v47 = vpop.f32.mrf.mxu1 }
 0x305   : > { %v973_v48 = vadd.f32 %v972_v49, %v971_v38  ;;  %v951_v50 = vadd.f32 %v1156_v18, %v1336_v6 }
 0x306   : > { %v1158_v52 = vpop.f32.mrf.mxu1 }
 0x307   : > { %v974_v5 = vrot.slane %v973_v48, 2  ;;  %v966_v54 = vadd.f32 %v1107_v14, %v951_v50  ;;  %v1159_v55 = vadd.f32 %v1158_v52, %v1157_v47 }
 0x308   : > { %v1160_v56 = vpop.f32.mrf.mxu1 }
 0x309   : > { %v975_v39 = vadd.f32 %v974_v5, %v973_v48  ;;  %v978_v57 = vadd.f32 %v966_v54, %v965_v25  ;;  %v952_v61 = vadd.f32 %v1159_v55, %v1340_v8 }
 0x30a   : > { %v1161_v19 = vpop.f32.mrf.mxu1 }
 0x30b   : > { %v976_v1 = vrot.slane %v975_v39, 1  ;;  %v979_v3 = vrot.slane %v978_v57, 4  ;;  %v1162_v26 = vadd.f32 %v1161_v19, %v1160_v56  ;;  %v967_v63 = vadd.f32 %v1107_v14, %v952_v61 }
 0x30c   : > { %v1163_v16 = vpop.f32.mrf.mxu1 }
 0x30d   : > { %v977_v33 = vadd.f32 %v976_v1, %v975_v39  ;;  %v980_v62 = vadd.f32 %v979_v3, %v978_v57  ;;  %v953_v6 = vadd.f32 %v1162_v26, %v1342_v9 }
 0x30e   : > { %v1164_v0 = vpop.f32.mrf.mxu1 }
 0x30f   : > { %v1000_v60 = vmul.f32 0.0625, %v977_v33  ;;  %v981_v8 = vrot.slane %v980_v62, 2  ;;  %v968_v4 = vadd.f32 %v1107_v14, %v953_v6  ;;  %v1165_v34 = vadd.f32 %v1164_v0, %v1163_v16 }
 0x310   : > { %v1166_v12 = vpop.f32.mrf.mxu1 }
 0x311   : > { %1004 = vst [vmem:[%s1655_s20] sm:$0xff] %v1000_v60  ;;  %v982_v13 = vadd.f32 %v981_v8, %v980_v62  ;;  %v985_v42 = vadd.f32 %v968_v4, %v967_v63  ;;  %v954_v15 = vadd.f32 %v1165_v34, %v1346_v10 }
 0x312   : > { %v1167_v41 = vpop.f32.mrf.mxu1 }
 0x313   : > { %v983_v59 = vrot.slane %v982_v13, 1  ;;  %v986_v9 = vrot.slane %v985_v42, 4  ;;  %v1168_v20 = vadd.f32 %v1167_v41, %v1166_v12  ;;  %v969_v22 = vadd.f32 %v1107_v14, %v954_v15 }
 0x315   : > { %v984_v21 = vadd.f32 %v983_v59, %v982_v13  ;;  %v987_v51 = vadd.f32 %v986_v9, %v985_v42  ;;  %v955_v46 = vadd.f32 %v1168_v20, %v1348_v11 }
 0x317   : > { %v1001_v36 = vmul.f32 0.0625, %v984_v21  ;;  %v988_v58 = vrot.slane %v987_v51, 2  ;;  %v970_v24 = vadd.f32 %v1107_v14, %v955_v46 }
 0x319   : > { %1005 = vst [vmem:[%s1655_s20 + $0x8] sm:$0xff] %v1001_v36  ;;  %v989_v17 = vadd.f32 %v988_v58, %v987_v51  ;;  %v992_v27 = vadd.f32 %v970_v24, %v969_v22 }
 0x31b   : > { %v990_v28 = vrot.slane %v989_v17, 1  ;;  %v993_v29 = vrot.slane %v992_v27, 4 }
 0x31d   : > { %v991_v30 = vadd.f32 %v990_v28, %v989_v17  ;;  %v994_v31 = vadd.f32 %v993_v29, %v992_v27 }
 0x31f   : > { %v1002_v32 = vmul.f32 0.0625, %v991_v30  ;;  %v995_v10 = vrot.slane %v994_v31, 2 }
 0x321   : > { %1006 = vst [vmem:[%s1655_s20 + $0x10] sm:$0xff] %v1002_v32  ;;  %v996_v35 = vadd.f32 %v995_v10, %v994_v31 }
 0x323   : > { %v997_v23 = vrot.slane %v996_v35, 1 }
 0x325   : > { %v998_v40 = vadd.f32 %v997_v23, %v996_v35 }
 0x327   : > { %v1003_v7 = vmul.f32 0.0625, %v998_v40 }
 0x329   : > { %1007 = vst [vmem:[%s1655_s20 + $0x18] sm:$0xff] %v1003_v7 }
 0x32a PF: > { %s17_s24 = sadd.s32 1, %s1272_s24  }
 0x32b   : > { %p14_p5 = scmp.ge.s32.totalorder %s17_s24, 4  }
 0x32d   :  { %16 = sbr.rel (!%p14_p5) target bundleno = 1 (0x1), region = 78 }

// kernel: clip_dualist_forward.5
= control target key start
LH: loop header
LB: loop body
LE: loop exit
PB: predicated region body
PF: predicated region fallthrough
CT: control target
= control target key end

     0   :  { %vm447_vm0 = vmmov 0   ;;  %s729_s1 = inlined_call_operand.vmem [shape: f32[640,128], index: 1, kind: input, shape index: {}]   ;;  %s730_s0 = inlined_call_operand.vmem [shape: f32[8,640], index: 0, kind: input, shape index: {}]   ;;  %s731_s2 = inlined_call_operand.vmem [shape: f32[1,128], index: 2, kind: input, shape index: {}]   ;;  %s732_s3 = inlined_call_operand.vmem [shape: f32[8,128], index: 3, kind: output, shape index: {}]  }
   0x1   :  { %v50_v0 = vld [vmem:[%s729_s1 + $0xf8] sm:$0xff]  ;;  %v49_v2 = vld [vmem:[%s729_s1 + $0xf0] sm:$0xff]  ;;  %v48_v6 = vld [vmem:[%s729_s1 + $0xe8] sm:$0xff] }
   0x2   :  { %v34_v1 = vld [vmem:[%s729_s1 + $0x78] sm:$0xff]  ;;  %322 = vmatprep.subr.mxu0 %v50_v0  ;;  %v33_v4 = vld [vmem:[%s729_s1 + $0x70] sm:$0xff]  ;;  %v32_v8 = vld [vmem:[%s729_s1 + $0x68] sm:$0xff] }
   0x3   :  { %v82_v3 = vld [vmem:[%s729_s1 + $0x1f8] sm:$0xff]  ;;  %323 = vmatpush3.msra.mxu0 %v34_v1  ;;  %v81_v7 = vld [vmem:[%s729_s1 + $0x1f0] sm:$0xff]  ;;  %v80_v10 = vld [vmem:[%s729_s1 + $0x1e8] sm:$0xff] }
   0x4   :  { %v66_v5 = vld [vmem:[%s729_s1 + $0x178] sm:$0xff]  ;;  %357 = vmatprep.subr.mxu1 %v82_v3  ;;  %324 = vmatprep.subr.mxu0 %v49_v2  ;;  %v65_v9 = vld [vmem:[%s729_s1 + $0x170] sm:$0xff]  ;;  %v47_v11 = vld [vmem:[%s729_s1 + $0xe0] sm:$0xff] }
   0x5   :  { %358 = vmatpush3.msra.mxu1 %v66_v5  ;;  %325 = vmatpush3.msra.mxu0 %v33_v4  ;;  %v64_v12 = vld [vmem:[%s729_s1 + $0x168] sm:$0xff]  ;;  %v31_v13 = vld [vmem:[%s729_s1 + $0x60] sm:$0xff]  ;;  %v46_v15 = vld [vmem:[%s729_s1 + $0xd8] sm:$0xff]  ;;  %v446_v5 = vmov 0.0  }
   0x6   :  { %359 = vmatprep.subr.mxu1 %v81_v7  ;;  %326 = vmatprep.subr.mxu0 %v48_v6  ;;  %v79_v14 = vld [vmem:[%s729_s1 + $0x1e0] sm:$0xff]  ;;  %v30_v17 = vld [vmem:[%s729_s1 + $0x58] sm:$0xff]  ;;  %v45_v19 = vld [vmem:[%s729_s1 + $0xd0] sm:$0xff] }
   0x7   :  { %360 = vmatpush3.msra.mxu1 %v65_v9  ;;  %327 = vmatpush3.msra.mxu0 %v32_v8  ;;  %v63_v16 = vld [vmem:[%s729_s1 + $0x160] sm:$0xff]  ;;  %v78_v18 = vld [vmem:[%s729_s1 + $0x1d8] sm:$0xff]  ;;  %v29_v21 = vld [vmem:[%s729_s1 + $0x50] sm:$0xff] }
   0x8   :  { %361 = vmatprep.subr.mxu1 %v80_v10  ;;  %328 = vmatprep.subr.mxu0 %v47_v11  ;;  %v62_v20 = vld [vmem:[%s729_s1 + $0x158] sm:$0xff]  ;;  %v77_v22 = vld [vmem:[%s729_s1 + $0x1d0] sm:$0xff]  ;;  %v44_v23 = vld [vmem:[%s729_s1 + $0xc8] sm:$0xff] }
   0x9   :  { %362 = vmatpush3.msra.mxu1 %v64_v12  ;;  %329 = vmatpush3.msra.mxu0 %v31_v13  ;;  %v61_v24 = vld [vmem:[%s729_s1 + $0x150] sm:$0xff]  ;;  %v28_v25 = vld [vmem:[%s729_s1 + $0x48] sm:$0xff]  ;;  %v43_v27 = vld [vmem:[%s729_s1 + $0xc0] sm:$0xff] }
   0xa   :  { %363 = vmatprep.subr.mxu1 %v79_v14  ;;  %330 = vmatprep.subr.mxu0 %v46_v15  ;;  %v76_v26 = vld [vmem:[%s729_s1 + $0x1c8] sm:$0xff]  ;;  %v27_v29 = vld [vmem:[%s729_s1 + $0x40] sm:$0xff]  ;;  %v42_v31 = vld [vmem:[%s729_s1 + $0xb8] sm:$0xff] }
   0xb   :  { %364 = vmatpush3.msra.mxu1 %v63_v16  ;;  %331 = vmatpush3.msra.mxu0 %v30_v17  ;;  %v60_v28 = vld [vmem:[%s729_s1 + $0x148] sm:$0xff]  ;;  %v75_v30 = vld [vmem:[%s729_s1 + $0x1c0] sm:$0xff]  ;;  %v26_v33 = vld [vmem:[%s729_s1 + $0x38] sm:$0xff] }
   0xc   :  { %365 = vmatprep.subr.mxu1 %v78_v18  ;;  %332 = vmatprep.subr.mxu0 %v45_v19  ;;  %v59_v32 = vld [vmem:[%s729_s1 + $0x140] sm:$0xff]  ;;  %v74_v34 = vld [vmem:[%s729_s1 + $0x1b8] sm:$0xff]  ;;  %v41_v35 = vld [vmem:[%s729_s1 + $0xb0] sm:$0xff] }
   0xd   :  { %366 = vmatpush3.msra.mxu1 %v62_v20  ;;  %333 = vmatpush3.msra.mxu0 %v29_v21  ;;  %v58_v36 = vld [vmem:[%s729_s1 + $0x138] sm:$0xff]  ;;  %v25_v37 = vld [vmem:[%s729_s1 + $0x30] sm:$0xff]  ;;  %v40_v39 = vld [vmem:[%s729_s1 + $0xa8] sm:$0xff] }
   0xe   :  { %367 = vmatprep.subr.mxu1 %v77_v22  ;;  %334 = vmatprep.subr.mxu0 %v44_v23  ;;  %v73_v38 = vld [vmem:[%s729_s1 + $0x1b0] sm:$0xff]  ;;  %v24_v41 = vld [vmem:[%s729_s1 + $0x28] sm:$0xff]  ;;  %v39_v43 = vld [vmem:[%s729_s1 + $0xa0] sm:$0xff] }
   0xf   :  { %368 = vmatpush3.msra.mxu1 %v61_v24  ;;  %335 = vmatpush3.msra.mxu0 %v28_v25  ;;  %v57_v40 = vld [vmem:[%s729_s1 + $0x130] sm:$0xff]  ;;  %v72_v42 = vld [vmem:[%s729_s1 + $0x1a8] sm:$0xff]  ;;  %v23_v45 = vld [vmem:[%s729_s1 + $0x20] sm:$0xff] }
  0x10   :  { %369 = vmatprep.subr.mxu1 %v76_v26  ;;  %336 = vmatprep.subr.mxu0 %v43_v27  ;;  %v56_v44 = vld [vmem:[%s729_s1 + $0x128] sm:$0xff]  ;;  %v71_v46 = vld [vmem:[%s729_s1 + $0x1a0] sm:$0xff]  ;;  %v38_v47 = vld [vmem:[%s729_s1 + $0x98] sm:$0xff] }
  0x11   :  { %370 = vmatpush3.msra.mxu1 %v60_v28  ;;  %337 = vmatpush3.msra.mxu0 %v27_v29  ;;  %v55_v48 = vld [vmem:[%s729_s1 + $0x120] sm:$0xff]  ;;  %v22_v49 = vld [vmem:[%s729_s1 + $0x18] sm:$0xff]  ;;  %v37_v51 = vld [vmem:[%s729_s1 + $0x90] sm:$0xff] }
  0x12   :  { %371 = vmatprep.subr.mxu1 %v75_v30  ;;  %338 = vmatprep.subr.mxu0 %v42_v31  ;;  %v70_v50 = vld [vmem:[%s729_s1 + $0x198] sm:$0xff]  ;;  %v21_v53 = vld [vmem:[%s729_s1 + $0x10] sm:$0xff]  ;;  %v36_v55 = vld [vmem:[%s729_s1 + $0x88] sm:$0xff] }
  0x13   :  { %372 = vmatpush3.msra.mxu1 %v59_v32  ;;  %339 = vmatpush3.msra.mxu0 %v26_v33  ;;  %v54_v52 = vld [vmem:[%s729_s1 + $0x118] sm:$0xff]  ;;  %v69_v54 = vld [vmem:[%s729_s1 + $0x190] sm:$0xff]  ;;  %v20_v57 = vld [vmem:[%s729_s1 + $0x8] sm:$0xff] }
  0x14   :  { %373 = vmatprep.subr.mxu1 %v74_v34  ;;  %340 = vmatprep.subr.mxu0 %v41_v35  ;;  %v53_v56 = vld [vmem:[%s729_s1 + $0x110] sm:$0xff]  ;;  %v68_v58 = vld [vmem:[%s729_s1 + $0x188] sm:$0xff]  ;;  %v35_v59 = vld [vmem:[%s729_s1 + $0x80] sm:$0xff] }
  0x15   :  { %374 = vmatpush3.msra.mxu1 %v58_v36  ;;  %341 = vmatpush3.msra.mxu0 %v25_v37  ;;  %v15_v60 = vld [vmem:[%s730_s0 + $0x8] sm:$0xff]  ;;  %v19_v61 = vld [vmem:[%s729_s1] sm:$0xff]  ;;  %v17_v2 = vld [vmem:[%s730_s0 + $0x18] sm:$0xff] }
  0x16   :  { %375 = vmatprep.subr.mxu1 %v73_v38  ;;  %342 = vmatprep.subr.mxu0 %v40_v39  ;;  %v52_v62 = vld [vmem:[%s729_s1 + $0x108] sm:$0xff]  ;;  %v14_v63 = vld [vmem:[%s730_s0] sm:$0xff]  ;;  %v98_v3 = vld [vmem:[%s729_s1 + $0x278] sm:$0xff] }
  0x17   :  { %376 = vmatpush3.msra.mxu1 %v57_v40  ;;  %343 = vmatpush3.msra.mxu0 %v24_v41  ;;  %v67_v0 = vld [vmem:[%s729_s1 + $0x180] sm:$0xff]  ;;  %v16_v4 = vld [vmem:[%s730_s0 + $0x10] sm:$0xff]  ;;  %v96_v7 = vld [vmem:[%s729_s1 + $0x268] sm:$0xff] }
  0x18   :  { %377 = vmatprep.subr.mxu1 %v72_v42  ;;  %344 = vmatprep.subr.mxu0 %v39_v43  ;;  %v51_v1 = vld [vmem:[%s729_s1 + $0x100] sm:$0xff]  ;;  %v97_v6 = vld [vmem:[%s729_s1 + $0x270] sm:$0xff]  ;;  %v94_v9 = vld [vmem:[%s729_s1 + $0x258] sm:$0xff] }
  0x19   :  { %378 = vmatpush3.msra.mxu1 %v56_v44  ;;  %345 = vmatpush3.msra.mxu0 %v23_v45  ;;  %v95_v8 = vld [vmem:[%s729_s1 + $0x260] sm:$0xff]  ;;  %v93_v10 = vld [vmem:[%s729_s1 + $0x250] sm:$0xff]  ;;  %v92_v11 = vld [vmem:[%s729_s1 + $0x248] sm:$0xff] }
  0x1a   :  { %379 = vmatprep.subr.mxu1 %v71_v46  ;;  %346 = vmatprep.subr.mxu0 %v38_v47  ;;  %v91_v12 = vld [vmem:[%s729_s1 + $0x240] sm:$0xff]  ;;  %v90_v13 = vld [vmem:[%s729_s1 + $0x238] sm:$0xff]  ;;  %v89_v14 = vld [vmem:[%s729_s1 + $0x230] sm:$0xff] }
  0x1b   :  { %380 = vmatpush3.msra.mxu1 %v55_v48  ;;  %347 = vmatpush3.msra.mxu0 %v22_v49  ;;  %v88_v15 = vld [vmem:[%s729_s1 + $0x228] sm:$0xff]  ;;  %v87_v16 = vld [vmem:[%s729_s1 + $0x220] sm:$0xff]  ;;  %v86_v17 = vld [vmem:[%s729_s1 + $0x218] sm:$0xff] }
  0x1c   :  { %381 = vmatprep.subr.mxu1 %v70_v50  ;;  %348 = vmatprep.subr.mxu0 %v37_v51  ;;  %v85_v18 = vld [vmem:[%s729_s1 + $0x210] sm:$0xff]  ;;  %v84_v19 = vld [vmem:[%s729_s1 + $0x208] sm:$0xff]  ;;  %v83_v20 = vld [vmem:[%s729_s1 + $0x200] sm:$0xff] }
  0x1d   :  { %382 = vmatpush3.msra.mxu1 %v54_v52  ;;  %349 = vmatpush3.msra.mxu0 %v21_v53  ;;  %v18_v21 = vld [vmem:[%s730_s0 + $0x20] sm:$0xff] }
  0x1e   :  { %383 = vmatprep.subr.mxu1 %v69_v54  ;;  %350 = vmatprep.subr.mxu0 %v36_v55  ;;  %v321_v26 = vld [vmem:[%s731_s2] ss:$0 sm:$0xff] }
  0x1f   :  { %384 = vmatpush3.msra.mxu1 %v53_v56  ;;  %351 = vmatpush3.msra.mxu0 %v20_v57 }
  0x20   :  { %385 = vmatprep.subr.mxu1 %v68_v58  ;;  %352 = vmatprep.subr.mxu0 %v35_v59 }
  0x21   :  { %170 = vmatprep.mubr.f32.mxu0 %v15_v60  ;;  %353 = vmatpush3.msra.mxu0 %v19_v61 }
  0x22   :  { %386 = vmatpush3.msra.mxu1 %v52_v62  ;;  %171 = vmatmul.mubr.f32.vlgmr.msra.gmra.mxu0 %v14_v63 }
  0x23   :  { %387 = vmatprep.subr.mxu1 %v67_v0  ;;  %409 = vmatprep.subr.mxu0 %v446_v5 }
  0x24   :  { %388 = vmatpush3.msra.mxu1 %v51_v1  ;;  %240 = vmatprep.mubr.f32.mxu1 %v17_v2 }
  0x25   :  { %410 = vmatpush3.msra.mxu0 %v98_v3  ;;  %241 = vmatmul.mubr.f32.vlgmr.msra.gmra.mxu1 %v16_v4 }
  0x26   :  { %411 = vmatprep.subr.mxu0 %v446_v5  ;;  %441 = vmatprep.mubr.msk.f32.mxu0 %vm447_vm0, %v446_v5 }
  0x27   :  { %412 = vmatpush3.msra.mxu0 %v97_v6 }
  0x28   :  { %413 = vmatprep.subr.mxu0 %v446_v5 }
  0x29   :  { %414 = vmatpush3.msra.mxu0 %v96_v7 }
  0x2a   :  { %415 = vmatprep.subr.mxu0 %v446_v5 }
  0x2b   :  { %416 = vmatpush3.msra.mxu0 %v95_v8 }
  0x2c   :  { %417 = vmatprep.subr.mxu0 %v446_v5 }
  0x2d   :  { %418 = vmatpush3.msra.mxu0 %v94_v9 }
  0x2e   :  { %419 = vmatprep.subr.mxu0 %v446_v5 }
  0x2f   :  { %420 = vmatpush3.msra.mxu0 %v93_v10 }
  0x30   :  { %421 = vmatprep.subr.mxu0 %v446_v5 }
  0x31   :  { %422 = vmatpush3.msra.mxu0 %v92_v11 }
  0x32   :  { %423 = vmatprep.subr.mxu0 %v446_v5 }
  0x33   :  { %424 = vmatpush3.msra.mxu0 %v91_v12 }
  0x34   :  { %425 = vmatprep.subr.mxu0 %v446_v5 }
  0x35   :  { %426 = vmatpush3.msra.mxu0 %v90_v13 }
  0x36   :  { %427 = vmatprep.subr.mxu0 %v446_v5 }
  0x37   :  { %428 = vmatpush3.msra.mxu0 %v89_v14 }
  0x38   :  { %429 = vmatprep.subr.mxu0 %v446_v5 }
  0x39   :  { %430 = vmatpush3.msra.mxu0 %v88_v15 }
  0x3a   :  { %431 = vmatprep.subr.mxu0 %v446_v5 }
  0x3b   :  { %432 = vmatpush3.msra.mxu0 %v87_v16 }
  0x3c   :  { %433 = vmatprep.subr.mxu0 %v446_v5 }
  0x3d   :  { %434 = vmatpush3.msra.mxu0 %v86_v17 }
  0x3e   :  { %435 = vmatprep.subr.mxu0 %v446_v5 }
  0x3f   :  { %436 = vmatpush3.msra.mxu0 %v85_v18 }
  0x40   :  { %437 = vmatprep.subr.mxu0 %v446_v5 }
  0x41   :  { %438 = vmatpush3.msra.mxu0 %v84_v19 }
  0x42   :  { %439 = vmatprep.subr.mxu0 %v446_v5 }
  0x43   :  { %440 = vmatpush3.msra.mxu0 %v83_v20 }
  0x44   :  { %442 = vmatmul.mubr.f32.vlgmr.msra.gmra.mxu0 %v18_v21 }
  0xe2   :  { %v354_v22 = vpop.f32.mrf.mxu0 }
  0xe4   :  { %v355_v23 = vpop.f32.mrf.mxu0 }
  0xe5   :  { %v389_v24 = vpop.f32.mrf.mxu1  ;;  %v356_v25 = vadd.f32 %v355_v23, %v354_v22 }
  0xe7   :  { %v390_v27 = vpop.f32.mrf.mxu1  ;;  %v173_v28 = vadd.f32 %v356_v25, %v321_v26 }
  0xe8   :  { %v391_v29 = vadd.f32 %v390_v27, %v389_v24 }
  0xea   :  { %v243_v30 = vadd.f32 %v391_v29, %v173_v28 }
 0x104   :  { %v312_v31 = vpop.f32.mrf.mxu0 }
 0x105   :  { %v313_v32 = vadd.f32 %v312_v31, %v243_v30 }
 0x106   :  { %v443_v33 = vpop.f32.mrf.mxu0 }
 0x107   :  { %316 = vst [vmem:[%s732_s3] sm:$0xff] %v313_v32 }

</bundles_post_ra>
